<compile_context>
chip_gen: v5e
topology: v5e:2x2
jax: 0.10.0
libtpu: 0.0.40
codegen_flags: <defaults>
</compile_context>

<pallas_src>
import functools

import jax
import jax.numpy as jnp
from jax import lax
from jax.experimental import pallas as pl
from jax.experimental.pallas import tpu as pltpu


def _sigmoid_tanh(x):
    # sigmoid(x) == 0.5 * tanh(0.5 * x) + 0.5  (single EUP op instead of exp+div)
    return 0.5 * jnp.tanh(0.5 * x) + 0.5


def _lstm_kernel(xf_ref, wih_ref, whh_ref, b_ref, fcw_ref, fcb_ref, out_ref, pg_ref,
                 *, seq_len: int, batch_pad: int, hidden_pad: int, matmul_dtype):
    """Full LSTM recurrence + FC head in one kernel call.

    xf_ref  : (T*Bp, I)      f32  time-major, batch padded to Bp (mult of 8)
    wih_ref : (I, 4*Hp)      f32  W_ih^T, each gate zero-padded to Hp=128 lanes
    whh_ref : (Hp, 4*Hp)     f32  W_hh^T, padded the same way
    b_ref   : (1, 4*Hp)      f32  b_ih + b_hh, gate-padded
    fcw_ref : (1, Hp)        f32  fc.weight padded with zeros
    fcb_ref : (1, 1)         f32
    out_ref : (Bp, 1)        f32
    pg_ref  : (T*Bp, 4*Hp)   f32  VMEM scratch holding the hoisted pre-gates
    """
    T, Bp, Hp = seq_len, batch_pad, hidden_pad
    G = 4 * Hp

    wih = wih_ref[...].astype(matmul_dtype)
    whh = whh_ref[...].astype(matmul_dtype)
    bias = b_ref[...]                                        # (1, G)

    # ---- Hoisted input projection: ONE big MXU matmul + bias, outside the loop.
    pg_ref[...] = (
        jnp.dot(xf_ref[...].astype(matmul_dtype), wih,
                preferred_element_type=jnp.float32)
        + bias
    )

    # ---- Serial recurrence: one small matmul + lane-aligned gate math per step.
    def step(t, carry):
        h, c = carry
        row = pl.multiple_of(t * Bp, Bp)
        pre = pg_ref[pl.ds(row, Bp), :]                      # (Bp, G)
        gates = pre + jnp.dot(h.astype(matmul_dtype), whh,
                              preferred_element_type=jnp.float32)
        # Each gate block is a full 128-lane vreg slice (Hp == 128 * k).
        i_g = _sigmoid_tanh(gates[:, 0 * Hp:1 * Hp])
        f_g = _sigmoid_tanh(gates[:, 1 * Hp:2 * Hp])
        g_g = jnp.tanh(gates[:, 2 * Hp:3 * Hp])
        o_g = _sigmoid_tanh(gates[:, 3 * Hp:4 * Hp])
        c_new = f_g * c + i_g * g_g
        h_new = o_g * jnp.tanh(c_new)
        return h_new, c_new

    h0 = jnp.zeros((Bp, Hp), jnp.float32)
    c0 = jnp.zeros((Bp, Hp), jnp.float32)
    h_last, _ = lax.fori_loop(0, T, step, (h0, c0), unroll=True)

    # ---- FC head as a VPU multiply + lane reduce (no N=1 MXU matmul).
    pred = jnp.sum(h_last * fcw_ref[...], axis=-1, keepdims=True) + fcb_ref[...]
    out_ref[...] = pred.astype(out_ref.dtype)


def lstm_forward(x_btd, w_ih, w_hh, b_ih, b_hh, fc_w, fc_b, *,
                 hidden_size, use_bf16_matmul=False):
    """Mirrors LSTM.forward of the PyTorch module.

    x_btd: (B, T, I) float32 (batch_first)
    w_ih : (4H, I), w_hh: (4H, H), b_ih/b_hh: (4H,)   -- PyTorch layout, [i,f,g,o]
    fc_w : (1, H),  fc_b: (1,)
    returns: (B,) float32    (== pred.squeeze())
    """
    B, T, I = x_btd.shape
    H = hidden_size
    H_pad = ((H + 127) // 128) * 128          # each gate block -> full 128-lane vregs
    B_pad = max(8, ((B + 7) // 8) * 8)        # sublane-dense batch tiles
    mm_dtype = jnp.bfloat16 if use_bf16_matmul else jnp.float32

    f32 = jnp.float32

    # --- weights: transpose + zero-pad each gate block to H_pad lanes ---------
    w4 = w_ih.astype(f32).reshape(4, H, I)                               # [g, h_out, i]
    w4 = jnp.pad(w4, ((0, 0), (0, H_pad - H), (0, 0)))
    wih_t = jnp.transpose(w4, (2, 0, 1)).reshape(I, 4 * H_pad)           # (I, 4Hp)

    v4 = w_hh.astype(f32).reshape(4, H, H)                               # [g, h_out, h_in]
    v4 = jnp.pad(v4, ((0, 0), (0, H_pad - H), (0, H_pad - H)))
    whh_t = jnp.transpose(v4, (2, 0, 1)).reshape(H_pad, 4 * H_pad)       # (Hp, 4Hp)

    b4 = (b_ih + b_hh).astype(f32).reshape(4, H)
    b4 = jnp.pad(b4, ((0, 0), (0, H_pad - H)))
    bias = b4.reshape(1, 4 * H_pad)                                      # (1, 4Hp)

    fcw_p = jnp.pad(fc_w.astype(f32), ((0, 0), (0, H_pad - H)))          # (1, Hp)
    fcb = fc_b.astype(f32).reshape(1, 1)                                 # (1, 1)

    # --- activations: time-major, batch padded, flattened for the big matmul --
    x_tb = jnp.transpose(x_btd.astype(f32), (1, 0, 2))                   # (T, B, I)
    x_tb = jnp.pad(x_tb, ((0, 0), (0, B_pad - B), (0, 0)))               # (T, Bp, I)
    x_flat = x_tb.reshape(T * B_pad, I)                                  # (T*Bp, I)

    vmem = pl.BlockSpec(memory_space=pltpu.MemorySpace.VMEM)

    out = pl.pallas_call(
        functools.partial(
            _lstm_kernel,
            seq_len=T, batch_pad=B_pad, hidden_pad=H_pad, matmul_dtype=mm_dtype),
        out_shape=jax.ShapeDtypeStruct((B_pad, 1), jnp.float32),
        in_specs=[vmem] * 6,
        out_specs=vmem,
        scratch_shapes=[pltpu.VMEM((T * B_pad, 4 * H_pad), jnp.float32)],
    )(x_flat, wih_t, whh_t, bias, fcw_p, fcb)

    return out[:B, 0]                                                    # (B,)


def _reference_forward(x_btd, w_ih, w_hh, b_ih, b_hh, fc_w, fc_b, *, hidden_size):
    """Pure-JAX reference (PyTorch nn.LSTM semantics)."""
    B, T, I = x_btd.shape
    H = hidden_size
    h = jnp.zeros((B, H), jnp.float32)
    c = jnp.zeros((B, H), jnp.float32)
    for t in range(T):
        gates = x_btd[:, t, :] @ w_ih.T + h @ w_hh.T + b_ih + b_hh
        i_g = jax.nn.sigmoid(gates[:, 0 * H:1 * H])
        f_g = jax.nn.sigmoid(gates[:, 1 * H:2 * H])
        g_g = jnp.tanh(gates[:, 2 * H:3 * H])
        o_g = jax.nn.sigmoid(gates[:, 3 * H:4 * H])
        c = f_g * c + i_g * g_g
        h = o_g * jnp.tanh(c)
    return jnp.squeeze(h @ fc_w.T + fc_b)


if __name__ == "__main__":
    # Module config (hidden_size from the PyTorch script; num_layers = 1)
    input_size = 16
    hidden_size = 64
    batch = 2
    seq = 8

    key = jax.random.PRNGKey(0)
    ks = jax.random.split(key, 8)
    bound = 1.0 / jnp.sqrt(hidden_size)   # PyTorch default init scale

    w_ih = jax.random.uniform(ks[0], (4 * hidden_size, input_size), jnp.float32, -bound, bound)
    w_hh = jax.random.uniform(ks[1], (4 * hidden_size, hidden_size), jnp.float32, -bound, bound)
    b_ih = jax.random.uniform(ks[2], (4 * hidden_size,), jnp.float32, -bound, bound)
    b_hh = jax.random.uniform(ks[3], (4 * hidden_size,), jnp.float32, -bound, bound)
    fc_w = jax.random.uniform(ks[4], (1, hidden_size), jnp.float32, -bound, bound)
    fc_b = jax.random.uniform(ks[5], (1,), jnp.float32, -bound, bound)

    x = jax.random.normal(ks[6], (batch, seq, input_size), jnp.float32)

    ref = _reference_forward(x, w_ih, w_hh, b_ih, b_hh, fc_w, fc_b, hidden_size=hidden_size)

    # f32 MXU path (default; bit-faithful to the PyTorch module)
    pred = lstm_forward(x, w_ih, w_hh, b_ih, b_hh, fc_w, fc_b, hidden_size=hidden_size)
    pred = jax.block_until_ready(pred)
    assert pred.shape == (batch,)
    assert jnp.allclose(pred, ref, atol=1e-4, rtol=1e-4), (pred, ref)

    # bf16 MXU path (v6e/v7x-friendly); recurrence accumulates rounding, so loose tol.
    pred_bf16 = lstm_forward(x, w_ih, w_hh, b_ih, b_hh, fc_w, fc_b,
                             hidden_size=hidden_size, use_bf16_matmul=True)
    pred_bf16 = jax.block_until_ready(pred_bf16)
    assert jnp.allclose(pred_bf16, ref, atol=5e-2, rtol=5e-2), (pred_bf16, ref)

    print("KERNEL_OK")
</pallas_src>

<mosaic_0001>
module attributes {stable_mosaic.version = 11 : i64} {
  func.func @_lstm_kernel(%arg0: memref<64x16xf32, #tpu.memory_space<vmem>>, %arg1: memref<16x512xf32, #tpu.memory_space<vmem>>, %arg2: memref<128x512xf32, #tpu.memory_space<vmem>>, %arg3: memref<1x512xf32, #tpu.memory_space<vmem>>, %arg4: memref<1x128xf32, #tpu.memory_space<vmem>>, %arg5: memref<1x1xf32, #tpu.memory_space<vmem>>, %arg6: memref<8x1xf32, #tpu.memory_space<vmem>>, %arg7: memref<64x512xf32, #tpu.memory_space<vmem>>) attributes {dimension_semantics = [], scalar_prefetch = 0 : i64, scratch_operands = 1 : i64, tpu.core_type = #tpu.core_type<tc>} {
    %c0 = arith.constant 0 : index
    %c0_0 = arith.constant 0 : index
    %0 = vector.load %arg1[%c0, %c0_0] : memref<16x512xf32, #tpu.memory_space<vmem>>, vector<16x512xf32>
    %c0_1 = arith.constant 0 : index
    %c0_2 = arith.constant 0 : index
    %1 = vector.load %arg2[%c0_1, %c0_2] : memref<128x512xf32, #tpu.memory_space<vmem>>, vector<128x512xf32>
    %c0_3 = arith.constant 0 : index
    %c0_4 = arith.constant 0 : index
    %2 = vector.load %arg3[%c0_3, %c0_4] : memref<1x512xf32, #tpu.memory_space<vmem>>, vector<1x512xf32>
    %c0_5 = arith.constant 0 : index
    %c0_6 = arith.constant 0 : index
    %3 = vector.load %arg0[%c0_5, %c0_6] : memref<64x16xf32, #tpu.memory_space<vmem>>, vector<64x16xf32>
    %cst = arith.constant dense<0.000000e+00> : vector<64x512xf32>
    %4 = tpu.matmul %3, %0, %cst {dimension_numbers = #tpu.dot_dimension_numbers<[1], [0], [0], [1], [0, 0, 1, 1], [], []>} : vector<64x16xf32>, vector<16x512xf32>, vector<64x512xf32> -> vector<64x512xf32>
    %5 = vector.broadcast %2 : vector<1x512xf32> to vector<64x512xf32>
    %6 = arith.addf %4, %5 : vector<64x512xf32>
    %c0_7 = arith.constant 0 : index
    %c0_8 = arith.constant 0 : index
    %7 = vector.load %arg7[%c0_7, %c0_8] : memref<64x512xf32, #tpu.memory_space<vmem>>, vector<64x512xf32>
    tpu.vector_store %arg7[%c0_7, %c0_8], %6 {strides = array<i32>} : memref<64x512xf32, #tpu.memory_space<vmem>>, vector<64x512xf32>,
    %cst_9 = arith.constant 0.000000e+00 : f32
    %8 = vector.broadcast %cst_9 : f32 to vector<8x128xf32>
    %cst_10 = arith.constant 0.000000e+00 : f32
    %9 = vector.broadcast %cst_10 : f32 to vector<8x128xf32>
    %c0_i32 = arith.constant 0 : i32
    %c8_i32 = arith.constant 8 : i32
    %10 = arith.muli %c0_i32, %c8_i32 : i32
    %11 = tpu.assume_multiple %10, 8 : i32
    %12 = arith.index_cast %11 : i32 to index
    %c0_11 = arith.constant 0 : index
    %13 = vector.load %arg7[%12, %c0_11] : memref<64x512xf32, #tpu.memory_space<vmem>>, vector<8x512xf32>
    %cst_12 = arith.constant dense<0.000000e+00> : vector<8x512xf32>
    %14 = tpu.matmul %8, %1, %cst_12 {dimension_numbers = #tpu.dot_dimension_numbers<[1], [0], [0], [1], [0, 0, 1, 1], [], []>} : vector<8x128xf32>, vector<128x512xf32>, vector<8x512xf32> -> vector<8x512xf32>
    %15 = arith.addf %13, %14 : vector<8x512xf32>
    %16 = vector.extract_strided_slice %15 {offsets = [0, 0], sizes = [8, 128], strides = [1, 1]} : vector<8x512xf32> to vector<8x128xf32>
    %cst_13 = arith.constant 5.000000e-01 : f32
    %17 = vector.broadcast %cst_13 : f32 to vector<8x128xf32>
    %18 = arith.mulf %17, %16 : vector<8x128xf32>
    %19 = math.tanh %18 : vector<8x128xf32>
    %cst_14 = arith.constant 5.000000e-01 : f32
    %20 = vector.broadcast %cst_14 : f32 to vector<8x128xf32>
    %21 = arith.mulf %20, %19 : vector<8x128xf32>
    %cst_15 = arith.constant 5.000000e-01 : f32
    %22 = vector.broadcast %cst_15 : f32 to vector<8x128xf32>
    %23 = arith.addf %21, %22 : vector<8x128xf32>
    %24 = vector.extract_strided_slice %15 {offsets = [0, 128], sizes = [8, 128], strides = [1, 1]} : vector<8x512xf32> to vector<8x128xf32>
    %cst_16 = arith.constant 5.000000e-01 : f32
    %25 = vector.broadcast %cst_16 : f32 to vector<8x128xf32>
    %26 = arith.mulf %25, %24 : vector<8x128xf32>
    %27 = math.tanh %26 : vector<8x128xf32>
    %cst_17 = arith.constant 5.000000e-01 : f32
    %28 = vector.broadcast %cst_17 : f32 to vector<8x128xf32>
    %29 = arith.mulf %28, %27 : vector<8x128xf32>
    %cst_18 = arith.constant 5.000000e-01 : f32
    %30 = vector.broadcast %cst_18 : f32 to vector<8x128xf32>
    %31 = arith.addf %29, %30 : vector<8x128xf32>
    %32 = vector.extract_strided_slice %15 {offsets = [0, 256], sizes = [8, 128], strides = [1, 1]} : vector<8x512xf32> to vector<8x128xf32>
    %33 = math.tanh %32 : vector<8x128xf32>
    %34 = vector.extract_strided_slice %15 {offsets = [0, 384], sizes = [8, 128], strides = [1, 1]} : vector<8x512xf32> to vector<8x128xf32>
    %cst_19 = arith.constant 5.000000e-01 : f32
    %35 = vector.broadcast %cst_19 : f32 to vector<8x128xf32>
    %36 = arith.mulf %35, %34 : vector<8x128xf32>
    %37 = math.tanh %36 : vector<8x128xf32>
    %cst_20 = arith.constant 5.000000e-01 : f32
    %38 = vector.broadcast %cst_20 : f32 to vector<8x128xf32>
    %39 = arith.mulf %38, %37 : vector<8x128xf32>
    %cst_21 = arith.constant 5.000000e-01 : f32
    %40 = vector.broadcast %cst_21 : f32 to vector<8x128xf32>
    %41 = arith.addf %39, %40 : vector<8x128xf32>
    %42 = arith.mulf %31, %9 : vector<8x128xf32>
    %43 = arith.mulf %23, %33 : vector<8x128xf32>
    %44 = arith.addf %42, %43 : vector<8x128xf32>
    %45 = math.tanh %44 : vector<8x128xf32>
    %46 = arith.mulf %41, %45 : vector<8x128xf32>
    %c1_i32 = arith.constant 1 : i32
    %c8_i32_22 = arith.constant 8 : i32
    %47 = arith.muli %c1_i32, %c8_i32_22 : i32
    %48 = tpu.assume_multiple %47, 8 : i32
    %49 = arith.index_cast %48 : i32 to index
    %c0_23 = arith.constant 0 : index
    %50 = vector.load %arg7[%49, %c0_23] : memref<64x512xf32, #tpu.memory_space<vmem>>, vector<8x512xf32>
    %cst_24 = arith.constant dense<0.000000e+00> : vector<8x512xf32>
    %51 = tpu.matmul %46, %1, %cst_24 {dimension_numbers = #tpu.dot_dimension_numbers<[1], [0], [0], [1], [0, 0, 1, 1], [], []>} : vector<8x128xf32>, vector<128x512xf32>, vector<8x512xf32> -> vector<8x512xf32>
    %52 = arith.addf %50, %51 : vector<8x512xf32>
    %53 = vector.extract_strided_slice %52 {offsets = [0, 0], sizes = [8, 128], strides = [1, 1]} : vector<8x512xf32> to vector<8x128xf32>
    %cst_25 = arith.constant 5.000000e-01 : f32
    %54 = vector.broadcast %cst_25 : f32 to vector<8x128xf32>
    %55 = arith.mulf %54, %53 : vector<8x128xf32>
    %56 = math.tanh %55 : vector<8x128xf32>
    %cst_26 = arith.constant 5.000000e-01 : f32
    %57 = vector.broadcast %cst_26 : f32 to vector<8x128xf32>
    %58 = arith.mulf %57, %56 : vector<8x128xf32>
    %cst_27 = arith.constant 5.000000e-01 : f32
    %59 = vector.broadcast %cst_27 : f32 to vector<8x128xf32>
    %60 = arith.addf %58, %59 : vector<8x128xf32>
    %61 = vector.extract_strided_slice %52 {offsets = [0, 128], sizes = [8, 128], strides = [1, 1]} : vector<8x512xf32> to vector<8x128xf32>
    %cst_28 = arith.constant 5.000000e-01 : f32
    %62 = vector.broadcast %cst_28 : f32 to vector<8x128xf32>
    %63 = arith.mulf %62, %61 : vector<8x128xf32>
    %64 = math.tanh %63 : vector<8x128xf32>
    %cst_29 = arith.constant 5.000000e-01 : f32
    %65 = vector.broadcast %cst_29 : f32 to vector<8x128xf32>
    %66 = arith.mulf %65, %64 : vector<8x128xf32>
    %cst_30 = arith.constant 5.000000e-01 : f32
    %67 = vector.broadcast %cst_30 : f32 to vector<8x128xf32>
    %68 = arith.addf %66, %67 : vector<8x128xf32>
    %69 = vector.extract_strided_slice %52 {offsets = [0, 256], sizes = [8, 128], strides = [1, 1]} : vector<8x512xf32> to vector<8x128xf32>
    %70 = math.tanh %69 : vector<8x128xf32>
    %71 = vector.extract_strided_slice %52 {offsets = [0, 384], sizes = [8, 128], strides = [1, 1]} : vector<8x512xf32> to vector<8x128xf32>
    %cst_31 = arith.constant 5.000000e-01 : f32
    %72 = vector.broadcast %cst_31 : f32 to vector<8x128xf32>
    %73 = arith.mulf %72, %71 : vector<8x128xf32>
    %74 = math.tanh %73 : vector<8x128xf32>
    %cst_32 = arith.constant 5.000000e-01 : f32
    %75 = vector.broadcast %cst_32 : f32 to vector<8x128xf32>
    %76 = arith.mulf %75, %74 : vector<8x128xf32>
    %cst_33 = arith.constant 5.000000e-01 : f32
    %77 = vector.broadcast %cst_33 : f32 to vector<8x128xf32>
    %78 = arith.addf %76, %77 : vector<8x128xf32>
    %79 = arith.mulf %68, %44 : vector<8x128xf32>
    %80 = arith.mulf %60, %70 : vector<8x128xf32>
    %81 = arith.addf %79, %80 : vector<8x128xf32>
    %82 = math.tanh %81 : vector<8x128xf32>
    %83 = arith.mulf %78, %82 : vector<8x128xf32>
    %c2_i32 = arith.constant 2 : i32
    %c8_i32_34 = arith.constant 8 : i32
    %84 = arith.muli %c2_i32, %c8_i32_34 : i32
    %85 = tpu.assume_multiple %84, 8 : i32
    %86 = arith.index_cast %85 : i32 to index
    %c0_35 = arith.constant 0 : index
    %87 = vector.load %arg7[%86, %c0_35] : memref<64x512xf32, #tpu.memory_space<vmem>>, vector<8x512xf32>
    %cst_36 = arith.constant dense<0.000000e+00> : vector<8x512xf32>
    %88 = tpu.matmul %83, %1, %cst_36 {dimension_numbers = #tpu.dot_dimension_numbers<[1], [0], [0], [1], [0, 0, 1, 1], [], []>} : vector<8x128xf32>, vector<128x512xf32>, vector<8x512xf32> -> vector<8x512xf32>
    %89 = arith.addf %87, %88 : vector<8x512xf32>
    %90 = vector.extract_strided_slice %89 {offsets = [0, 0], sizes = [8, 128], strides = [1, 1]} : vector<8x512xf32> to vector<8x128xf32>
    %cst_37 = arith.constant 5.000000e-01 : f32
    %91 = vector.broadcast %cst_37 : f32 to vector<8x128xf32>
    %92 = arith.mulf %91, %90 : vector<8x128xf32>
    %93 = math.tanh %92 : vector<8x128xf32>
    %cst_38 = arith.constant 5.000000e-01 : f32
    %94 = vector.broadcast %cst_38 : f32 to vector<8x128xf32>
    %95 = arith.mulf %94, %93 : vector<8x128xf32>
    %cst_39 = arith.constant 5.000000e-01 : f32
    %96 = vector.broadcast %cst_39 : f32 to vector<8x128xf32>
    %97 = arith.addf %95, %96 : vector<8x128xf32>
    %98 = vector.extract_strided_slice %89 {offsets = [0, 128], sizes = [8, 128], strides = [1, 1]} : vector<8x512xf32> to vector<8x128xf32>
    %cst_40 = arith.constant 5.000000e-01 : f32
    %99 = vector.broadcast %cst_40 : f32 to vector<8x128xf32>
    %100 = arith.mulf %99, %98 : vector<8x128xf32>
    %101 = math.tanh %100 : vector<8x128xf32>
    %cst_41 = arith.constant 5.000000e-01 : f32
    %102 = vector.broadcast %cst_41 : f32 to vector<8x128xf32>
    %103 = arith.mulf %102, %101 : vector<8x128xf32>
    %cst_42 = arith.constant 5.000000e-01 : f32
    %104 = vector.broadcast %cst_42 : f32 to vector<8x128xf32>
    %105 = arith.addf %103, %104 : vector<8x128xf32>
    %106 = vector.extract_strided_slice %89 {offsets = [0, 256], sizes = [8, 128], strides = [1, 1]} : vector<8x512xf32> to vector<8x128xf32>
    %107 = math.tanh %106 : vector<8x128xf32>
    %108 = vector.extract_strided_slice %89 {offsets = [0, 384], sizes = [8, 128], strides = [1, 1]} : vector<8x512xf32> to vector<8x128xf32>
    %cst_43 = arith.constant 5.000000e-01 : f32
    %109 = vector.broadcast %cst_43 : f32 to vector<8x128xf32>
    %110 = arith.mulf %109, %108 : vector<8x128xf32>
    %111 = math.tanh %110 : vector<8x128xf32>
    %cst_44 = arith.constant 5.000000e-01 : f32
    %112 = vector.broadcast %cst_44 : f32 to vector<8x128xf32>
    %113 = arith.mulf %112, %111 : vector<8x128xf32>
    %cst_45 = arith.constant 5.000000e-01 : f32
    %114 = vector.broadcast %cst_45 : f32 to vector<8x128xf32>
    %115 = arith.addf %113, %114 : vector<8x128xf32>
    %116 = arith.mulf %105, %81 : vector<8x128xf32>
    %117 = arith.mulf %97, %107 : vector<8x128xf32>
    %118 = arith.addf %116, %117 : vector<8x128xf32>
    %119 = math.tanh %118 : vector<8x128xf32>
    %120 = arith.mulf %115, %119 : vector<8x128xf32>
    %c3_i32 = arith.constant 3 : i32
    %c8_i32_46 = arith.constant 8 : i32
    %121 = arith.muli %c3_i32, %c8_i32_46 : i32
    %122 = tpu.assume_multiple %121, 8 : i32
    %123 = arith.index_cast %122 : i32 to index
    %c0_47 = arith.constant 0 : index
    %124 = vector.load %arg7[%123, %c0_47] : memref<64x512xf32, #tpu.memory_space<vmem>>, vector<8x512xf32>
    %cst_48 = arith.constant dense<0.000000e+00> : vector<8x512xf32>
    %125 = tpu.matmul %120, %1, %cst_48 {dimension_numbers = #tpu.dot_dimension_numbers<[1], [0], [0], [1], [0, 0, 1, 1], [], []>} : vector<8x128xf32>, vector<128x512xf32>, vector<8x512xf32> -> vector<8x512xf32>
    %126 = arith.addf %124, %125 : vector<8x512xf32>
    %127 = vector.extract_strided_slice %126 {offsets = [0, 0], sizes = [8, 128], strides = [1, 1]} : vector<8x512xf32> to vector<8x128xf32>
    %cst_49 = arith.constant 5.000000e-01 : f32
    %128 = vector.broadcast %cst_49 : f32 to vector<8x128xf32>
    %129 = arith.mulf %128, %127 : vector<8x128xf32>
    %130 = math.tanh %129 : vector<8x128xf32>
    %cst_50 = arith.constant 5.000000e-01 : f32
    %131 = vector.broadcast %cst_50 : f32 to vector<8x128xf32>
    %132 = arith.mulf %131, %130 : vector<8x128xf32>
    %cst_51 = arith.constant 5.000000e-01 : f32
    %133 = vector.broadcast %cst_51 : f32 to vector<8x128xf32>
    %134 = arith.addf %132, %133 : vector<8x128xf32>
    %135 = vector.extract_strided_slice %126 {offsets = [0, 128], sizes = [8, 128], strides = [1, 1]} : vector<8x512xf32> to vector<8x128xf32>
    %cst_52 = arith.constant 5.000000e-01 : f32
    %136 = vector.broadcast %cst_52 : f32 to vector<8x128xf32>
    %137 = arith.mulf %136, %135 : vector<8x128xf32>
    %138 = math.tanh %137 : vector<8x128xf32>
    %cst_53 = arith.constant 5.000000e-01 : f32
    %139 = vector.broadcast %cst_53 : f32 to vector<8x128xf32>
    %140 = arith.mulf %139, %138 : vector<8x128xf32>
    %cst_54 = arith.constant 5.000000e-01 : f32
    %141 = vector.broadcast %cst_54 : f32 to vector<8x128xf32>
    %142 = arith.addf %140, %141 : vector<8x128xf32>
    %143 = vector.extract_strided_slice %126 {offsets = [0, 256], sizes = [8, 128], strides = [1, 1]} : vector<8x512xf32> to vector<8x128xf32>
    %144 = math.tanh %143 : vector<8x128xf32>
    %145 = vector.extract_strided_slice %126 {offsets = [0, 384], sizes = [8, 128], strides = [1, 1]} : vector<8x512xf32> to vector<8x128xf32>
    %cst_55 = arith.constant 5.000000e-01 : f32
    %146 = vector.broadcast %cst_55 : f32 to vector<8x128xf32>
    %147 = arith.mulf %146, %145 : vector<8x128xf32>
    %148 = math.tanh %147 : vector<8x128xf32>
    %cst_56 = arith.constant 5.000000e-01 : f32
    %149 = vector.broadcast %cst_56 : f32 to vector<8x128xf32>
    %150 = arith.mulf %149, %148 : vector<8x128xf32>
    %cst_57 = arith.constant 5.000000e-01 : f32
    %151 = vector.broadcast %cst_57 : f32 to vector<8x128xf32>
    %152 = arith.addf %150, %151 : vector<8x128xf32>
    %153 = arith.mulf %142, %118 : vector<8x128xf32>
    %154 = arith.mulf %134, %144 : vector<8x128xf32>
    %155 = arith.addf %153, %154 : vector<8x128xf32>
    %156 = math.tanh %155 : vector<8x128xf32>
    %157 = arith.mulf %152, %156 : vector<8x128xf32>
    %c4_i32 = arith.constant 4 : i32
    %c8_i32_58 = arith.constant 8 : i32
    %158 = arith.muli %c4_i32, %c8_i32_58 : i32
    %159 = tpu.assume_multiple %158, 8 : i32
    %160 = arith.index_cast %159 : i32 to index
    %c0_59 = arith.constant 0 : index
    %161 = vector.load %arg7[%160, %c0_59] : memref<64x512xf32, #tpu.memory_space<vmem>>, vector<8x512xf32>
    %cst_60 = arith.constant dense<0.000000e+00> : vector<8x512xf32>
    %162 = tpu.matmul %157, %1, %cst_60 {dimension_numbers = #tpu.dot_dimension_numbers<[1], [0], [0], [1], [0, 0, 1, 1], [], []>} : vector<8x128xf32>, vector<128x512xf32>, vector<8x512xf32> -> vector<8x512xf32>
    %163 = arith.addf %161, %162 : vector<8x512xf32>
    %164 = vector.extract_strided_slice %163 {offsets = [0, 0], sizes = [8, 128], strides = [1, 1]} : vector<8x512xf32> to vector<8x128xf32>
    %cst_61 = arith.constant 5.000000e-01 : f32
    %165 = vector.broadcast %cst_61 : f32 to vector<8x128xf32>
    %166 = arith.mulf %165, %164 : vector<8x128xf32>
    %167 = math.tanh %166 : vector<8x128xf32>
    %cst_62 = arith.constant 5.000000e-01 : f32
    %168 = vector.broadcast %cst_62 : f32 to vector<8x128xf32>
    %169 = arith.mulf %168, %167 : vector<8x128xf32>
    %cst_63 = arith.constant 5.000000e-01 : f32
    %170 = vector.broadcast %cst_63 : f32 to vector<8x128xf32>
    %171 = arith.addf %169, %170 : vector<8x128xf32>
    %172 = vector.extract_strided_slice %163 {offsets = [0, 128], sizes = [8, 128], strides = [1, 1]} : vector<8x512xf32> to vector<8x128xf32>
    %cst_64 = arith.constant 5.000000e-01 : f32
    %173 = vector.broadcast %cst_64 : f32 to vector<8x128xf32>
    %174 = arith.mulf %173, %172 : vector<8x128xf32>
    %175 = math.tanh %174 : vector<8x128xf32>
    %cst_65 = arith.constant 5.000000e-01 : f32
    %176 = vector.broadcast %cst_65 : f32 to vector<8x128xf32>
    %177 = arith.mulf %176, %175 : vector<8x128xf32>
    %cst_66 = arith.constant 5.000000e-01 : f32
    %178 = vector.broadcast %cst_66 : f32 to vector<8x128xf32>
    %179 = arith.addf %177, %178 : vector<8x128xf32>
    %180 = vector.extract_strided_slice %163 {offsets = [0, 256], sizes = [8, 128], strides = [1, 1]} : vector<8x512xf32> to vector<8x128xf32>
    %181 = math.tanh %180 : vector<8x128xf32>
    %182 = vector.extract_strided_slice %163 {offsets = [0, 384], sizes = [8, 128], strides = [1, 1]} : vector<8x512xf32> to vector<8x128xf32>
    %cst_67 = arith.constant 5.000000e-01 : f32
    %183 = vector.broadcast %cst_67 : f32 to vector<8x128xf32>
    %184 = arith.mulf %183, %182 : vector<8x128xf32>
    %185 = math.tanh %184 : vector<8x128xf32>
    %cst_68 = arith.constant 5.000000e-01 : f32
    %186 = vector.broadcast %cst_68 : f32 to vector<8x128xf32>
    %187 = arith.mulf %186, %185 : vector<8x128xf32>
    %cst_69 = arith.constant 5.000000e-01 : f32
    %188 = vector.broadcast %cst_69 : f32 to vector<8x128xf32>
    %189 = arith.addf %187, %188 : vector<8x128xf32>
    %190 = arith.mulf %179, %155 : vector<8x128xf32>
    %191 = arith.mulf %171, %181 : vector<8x128xf32>
    %192 = arith.addf %190, %191 : vector<8x128xf32>
    %193 = math.tanh %192 : vector<8x128xf32>
    %194 = arith.mulf %189, %193 : vector<8x128xf32>
    %c5_i32 = arith.constant 5 : i32
    %c8_i32_70 = arith.constant 8 : i32
    %195 = arith.muli %c5_i32, %c8_i32_70 : i32
    %196 = tpu.assume_multiple %195, 8 : i32
    %197 = arith.index_cast %196 : i32 to index
    %c0_71 = arith.constant 0 : index
    %198 = vector.load %arg7[%197, %c0_71] : memref<64x512xf32, #tpu.memory_space<vmem>>, vector<8x512xf32>
    %cst_72 = arith.constant dense<0.000000e+00> : vector<8x512xf32>
    %199 = tpu.matmul %194, %1, %cst_72 {dimension_numbers = #tpu.dot_dimension_numbers<[1], [0], [0], [1], [0, 0, 1, 1], [], []>} : vector<8x128xf32>, vector<128x512xf32>, vector<8x512xf32> -> vector<8x512xf32>
    %200 = arith.addf %198, %199 : vector<8x512xf32>
    %201 = vector.extract_strided_slice %200 {offsets = [0, 0], sizes = [8, 128], strides = [1, 1]} : vector<8x512xf32> to vector<8x128xf32>
    %cst_73 = arith.constant 5.000000e-01 : f32
    %202 = vector.broadcast %cst_73 : f32 to vector<8x128xf32>
    %203 = arith.mulf %202, %201 : vector<8x128xf32>
    %204 = math.tanh %203 : vector<8x128xf32>
    %cst_74 = arith.constant 5.000000e-01 : f32
    %205 = vector.broadcast %cst_74 : f32 to vector<8x128xf32>
    %206 = arith.mulf %205, %204 : vector<8x128xf32>
    %cst_75 = arith.constant 5.000000e-01 : f32
    %207 = vector.broadcast %cst_75 : f32 to vector<8x128xf32>
    %208 = arith.addf %206, %207 : vector<8x128xf32>
    %209 = vector.extract_strided_slice %200 {offsets = [0, 128], sizes = [8, 128], strides = [1, 1]} : vector<8x512xf32> to vector<8x128xf32>
    %cst_76 = arith.constant 5.000000e-01 : f32
    %210 = vector.broadcast %cst_76 : f32 to vector<8x128xf32>
    %211 = arith.mulf %210, %209 : vector<8x128xf32>
    %212 = math.tanh %211 : vector<8x128xf32>
    %cst_77 = arith.constant 5.000000e-01 : f32
    %213 = vector.broadcast %cst_77 : f32 to vector<8x128xf32>
    %214 = arith.mulf %213, %212 : vector<8x128xf32>
    %cst_78 = arith.constant 5.000000e-01 : f32
    %215 = vector.broadcast %cst_78 : f32 to vector<8x128xf32>
    %216 = arith.addf %214, %215 : vector<8x128xf32>
    %217 = vector.extract_strided_slice %200 {offsets = [0, 256], sizes = [8, 128], strides = [1, 1]} : vector<8x512xf32> to vector<8x128xf32>
    %218 = math.tanh %217 : vector<8x128xf32>
    %219 = vector.extract_strided_slice %200 {offsets = [0, 384], sizes = [8, 128], strides = [1, 1]} : vector<8x512xf32> to vector<8x128xf32>
    %cst_79 = arith.constant 5.000000e-01 : f32
    %220 = vector.broadcast %cst_79 : f32 to vector<8x128xf32>
    %221 = arith.mulf %220, %219 : vector<8x128xf32>
    %222 = math.tanh %221 : vector<8x128xf32>
    %cst_80 = arith.constant 5.000000e-01 : f32
    %223 = vector.broadcast %cst_80 : f32 to vector<8x128xf32>
    %224 = arith.mulf %223, %222 : vector<8x128xf32>
    %cst_81 = arith.constant 5.000000e-01 : f32
    %225 = vector.broadcast %cst_81 : f32 to vector<8x128xf32>
    %226 = arith.addf %224, %225 : vector<8x128xf32>
    %227 = arith.mulf %216, %192 : vector<8x128xf32>
    %228 = arith.mulf %208, %218 : vector<8x128xf32>
    %229 = arith.addf %227, %228 : vector<8x128xf32>
    %230 = math.tanh %229 : vector<8x128xf32>
    %231 = arith.mulf %226, %230 : vector<8x128xf32>
    %c6_i32 = arith.constant 6 : i32
    %c8_i32_82 = arith.constant 8 : i32
    %232 = arith.muli %c6_i32, %c8_i32_82 : i32
    %233 = tpu.assume_multiple %232, 8 : i32
    %234 = arith.index_cast %233 : i32 to index
    %c0_83 = arith.constant 0 : index
    %235 = vector.load %arg7[%234, %c0_83] : memref<64x512xf32, #tpu.memory_space<vmem>>, vector<8x512xf32>
    %cst_84 = arith.constant dense<0.000000e+00> : vector<8x512xf32>
    %236 = tpu.matmul %231, %1, %cst_84 {dimension_numbers = #tpu.dot_dimension_numbers<[1], [0], [0], [1], [0, 0, 1, 1], [], []>} : vector<8x128xf32>, vector<128x512xf32>, vector<8x512xf32> -> vector<8x512xf32>
    %237 = arith.addf %235, %236 : vector<8x512xf32>
    %238 = vector.extract_strided_slice %237 {offsets = [0, 0], sizes = [8, 128], strides = [1, 1]} : vector<8x512xf32> to vector<8x128xf32>
    %cst_85 = arith.constant 5.000000e-01 : f32
    %239 = vector.broadcast %cst_85 : f32 to vector<8x128xf32>
    %240 = arith.mulf %239, %238 : vector<8x128xf32>
    %241 = math.tanh %240 : vector<8x128xf32>
    %cst_86 = arith.constant 5.000000e-01 : f32
    %242 = vector.broadcast %cst_86 : f32 to vector<8x128xf32>
    %243 = arith.mulf %242, %241 : vector<8x128xf32>
    %cst_87 = arith.constant 5.000000e-01 : f32
    %244 = vector.broadcast %cst_87 : f32 to vector<8x128xf32>
    %245 = arith.addf %243, %244 : vector<8x128xf32>
    %246 = vector.extract_strided_slice %237 {offsets = [0, 128], sizes = [8, 128], strides = [1, 1]} : vector<8x512xf32> to vector<8x128xf32>
    %cst_88 = arith.constant 5.000000e-01 : f32
    %247 = vector.broadcast %cst_88 : f32 to vector<8x128xf32>
    %248 = arith.mulf %247, %246 : vector<8x128xf32>
    %249 = math.tanh %248 : vector<8x128xf32>
    %cst_89 = arith.constant 5.000000e-01 : f32
    %250 = vector.broadcast %cst_89 : f32 to vector<8x128xf32>
    %251 = arith.mulf %250, %249 : vector<8x128xf32>
    %cst_90 = arith.constant 5.000000e-01 : f32
    %252 = vector.broadcast %cst_90 : f32 to vector<8x128xf32>
    %253 = arith.addf %251, %252 : vector<8x128xf32>
    %254 = vector.extract_strided_slice %237 {offsets = [0, 256], sizes = [8, 128], strides = [1, 1]} : vector<8x512xf32> to vector<8x128xf32>
    %255 = math.tanh %254 : vector<8x128xf32>
    %256 = vector.extract_strided_slice %237 {offsets = [0, 384], sizes = [8, 128], strides = [1, 1]} : vector<8x512xf32> to vector<8x128xf32>
    %cst_91 = arith.constant 5.000000e-01 : f32
    %257 = vector.broadcast %cst_91 : f32 to vector<8x128xf32>
    %258 = arith.mulf %257, %256 : vector<8x128xf32>
    %259 = math.tanh %258 : vector<8x128xf32>
    %cst_92 = arith.constant 5.000000e-01 : f32
    %260 = vector.broadcast %cst_92 : f32 to vector<8x128xf32>
    %261 = arith.mulf %260, %259 : vector<8x128xf32>
    %cst_93 = arith.constant 5.000000e-01 : f32
    %262 = vector.broadcast %cst_93 : f32 to vector<8x128xf32>
    %263 = arith.addf %261, %262 : vector<8x128xf32>
    %264 = arith.mulf %253, %229 : vector<8x128xf32>
    %265 = arith.mulf %245, %255 : vector<8x128xf32>
    %266 = arith.addf %264, %265 : vector<8x128xf32>
    %267 = math.tanh %266 : vector<8x128xf32>
    %268 = arith.mulf %263, %267 : vector<8x128xf32>
    %c7_i32 = arith.constant 7 : i32
    %c8_i32_94 = arith.constant 8 : i32
    %269 = arith.muli %c7_i32, %c8_i32_94 : i32
    %270 = tpu.assume_multiple %269, 8 : i32
    %271 = arith.index_cast %270 : i32 to index
    %c0_95 = arith.constant 0 : index
    %272 = vector.load %arg7[%271, %c0_95] : memref<64x512xf32, #tpu.memory_space<vmem>>, vector<8x512xf32>
    %cst_96 = arith.constant dense<0.000000e+00> : vector<8x512xf32>
    %273 = tpu.matmul %268, %1, %cst_96 {dimension_numbers = #tpu.dot_dimension_numbers<[1], [0], [0], [1], [0, 0, 1, 1], [], []>} : vector<8x128xf32>, vector<128x512xf32>, vector<8x512xf32> -> vector<8x512xf32>
    %274 = arith.addf %272, %273 : vector<8x512xf32>
    %275 = vector.extract_strided_slice %274 {offsets = [0, 0], sizes = [8, 128], strides = [1, 1]} : vector<8x512xf32> to vector<8x128xf32>
    %cst_97 = arith.constant 5.000000e-01 : f32
    %276 = vector.broadcast %cst_97 : f32 to vector<8x128xf32>
    %277 = arith.mulf %276, %275 : vector<8x128xf32>
    %278 = math.tanh %277 : vector<8x128xf32>
    %cst_98 = arith.constant 5.000000e-01 : f32
    %279 = vector.broadcast %cst_98 : f32 to vector<8x128xf32>
    %280 = arith.mulf %279, %278 : vector<8x128xf32>
    %cst_99 = arith.constant 5.000000e-01 : f32
    %281 = vector.broadcast %cst_99 : f32 to vector<8x128xf32>
    %282 = arith.addf %280, %281 : vector<8x128xf32>
    %283 = vector.extract_strided_slice %274 {offsets = [0, 128], sizes = [8, 128], strides = [1, 1]} : vector<8x512xf32> to vector<8x128xf32>
    %cst_100 = arith.constant 5.000000e-01 : f32
    %284 = vector.broadcast %cst_100 : f32 to vector<8x128xf32>
    %285 = arith.mulf %284, %283 : vector<8x128xf32>
    %286 = math.tanh %285 : vector<8x128xf32>
    %cst_101 = arith.constant 5.000000e-01 : f32
    %287 = vector.broadcast %cst_101 : f32 to vector<8x128xf32>
    %288 = arith.mulf %287, %286 : vector<8x128xf32>
    %cst_102 = arith.constant 5.000000e-01 : f32
    %289 = vector.broadcast %cst_102 : f32 to vector<8x128xf32>
    %290 = arith.addf %288, %289 : vector<8x128xf32>
    %291 = vector.extract_strided_slice %274 {offsets = [0, 256], sizes = [8, 128], strides = [1, 1]} : vector<8x512xf32> to vector<8x128xf32>
    %292 = math.tanh %291 : vector<8x128xf32>
    %293 = vector.extract_strided_slice %274 {offsets = [0, 384], sizes = [8, 128], strides = [1, 1]} : vector<8x512xf32> to vector<8x128xf32>
    %cst_103 = arith.constant 5.000000e-01 : f32
    %294 = vector.broadcast %cst_103 : f32 to vector<8x128xf32>
    %295 = arith.mulf %294, %293 : vector<8x128xf32>
    %296 = math.tanh %295 : vector<8x128xf32>
    %cst_104 = arith.constant 5.000000e-01 : f32
    %297 = vector.broadcast %cst_104 : f32 to vector<8x128xf32>
    %298 = arith.mulf %297, %296 : vector<8x128xf32>
    %cst_105 = arith.constant 5.000000e-01 : f32
    %299 = vector.broadcast %cst_105 : f32 to vector<8x128xf32>
    %300 = arith.addf %298, %299 : vector<8x128xf32>
    %301 = arith.mulf %290, %266 : vector<8x128xf32>
    %302 = arith.mulf %282, %292 : vector<8x128xf32>
    %303 = arith.addf %301, %302 : vector<8x128xf32>
    %304 = math.tanh %303 : vector<8x128xf32>
    %305 = arith.mulf %300, %304 : vector<8x128xf32>
    %c8_i32_106 = arith.constant 8 : i32
    %c0_107 = arith.constant 0 : index
    %c0_108 = arith.constant 0 : index
    %306 = vector.load %arg4[%c0_107, %c0_108] : memref<1x128xf32, #tpu.memory_space<vmem>>, vector<1x128xf32>
    %307 = vector.broadcast %306 : vector<1x128xf32> to vector<8x128xf32>
    %308 = arith.mulf %305, %307 : vector<8x128xf32>
    %cst_109 = arith.constant dense<0.000000e+00> : vector<8xf32>
    %309 = vector.multi_reduction <add>, %308, %cst_109 [1] : vector<8x128xf32> to vector<8xf32>
    %310 = vector.shape_cast %309 : vector<8xf32> to vector<8x1xf32>
    %c0_110 = arith.constant 0 : index
    %c0_111 = arith.constant 0 : index
    %311 = vector.load %arg5[%c0_110, %c0_111] : memref<1x1xf32, #tpu.memory_space<vmem>>, vector<1x1xf32>
    %312 = vector.broadcast %311 : vector<1x1xf32> to vector<8x1xf32>
    %313 = arith.addf %310, %312 : vector<8x1xf32>
    %c0_112 = arith.constant 0 : index
    %c0_113 = arith.constant 0 : index
    %314 = vector.load %arg6[%c0_112, %c0_113] : memref<8x1xf32, #tpu.memory_space<vmem>>, vector<8x1xf32>
    tpu.vector_store %arg6[%c0_112, %c0_113], %313 {strides = array<i32>} : memref<8x1xf32, #tpu.memory_space<vmem>>, vector<8x1xf32>,
    return
  }
}

</mosaic_0001>

<bundles_post_ra>
// kernel: tpu_custom_call.1
= control target key start
LH: loop header
LB: loop body
LE: loop exit
PB: predicated region body
PF: predicated region fallthrough
CT: control target
= control target key end

     0   :  { %s2490_s0 = inlined_call_operand.vmem [shape: f32[64,16], index: 0, kind: input, shape index: {}]   ;;  %s2491_s1 = inlined_call_operand.vmem [shape: f32[16,512], index: 1, kind: input, shape index: {}]   ;;  %s2492_s2 = inlined_call_operand.hbm [shape: f32[128,512], index: 2, kind: input, shape index: {}]   ;;  %s2493_s3 = inlined_call_operand.vmem [shape: f32[1,512], index: 3, kind: input, shape index: {}]   ;;  %s2494_s4 = inlined_call_operand.vmem [shape: f32[1,128], index: 4, kind: input, shape index: {}]   ;;  %s2495_s5 = inlined_call_operand.<no memory space> [shape: f32[1,1], index: 5, kind: input, shape index: {}]   ;;  %s2496_s6 = inlined_call_operand.vmem [shape: f32[8,1], index: 6, kind: output, shape index: {}]  }
   0x1   :  { %v11_v0 = vstv %s2495_s5 }
   0x2   :  { %12 = vst [vmem:[#allocation3] sm:$0x1] %v11_v0 }
   0x3   :  { %13 = vsyncpa [#allocation5], 0  ;;  %s22_s25 = sshll.u32 %s2492_s2, 4  ;;  %s1458_s26 = smov [#allocation4]   ;;  %s23_s25 = int_to_ptr.hbm [resolvable:$true] %s22_s25 }
   0x4   :  { %s24_s27 = sshll.u32 %s1458_s26, 4  ;;  %s1459_s28 = smov 512   ;;  %s25_s27 = int_to_ptr.vmem [resolvable:$true] %s24_s27 }
   0x5   :  { %s1460_s29 = smov 32  }
   0x6   :  { %30 = dma.hbm_to_vmem [thread:$0]  %s23_s25, 8192, %s25_s27, [#allocation5], %s1459_s28, %s1459_s28, %s1460_s29  }
   0x7   :  { %1456 = dma.done.wait [#allocation5], 8192  }
   0x8   :  { %1457 = vsyncadd [#allocation5], 4294959104  ;;  %v45_v1 = vld [vmem:[%s2491_s1 + $0x20] sm:$0xff]  ;;  %v46_v2 = vld [vmem:[%s2491_s1 + $0x28] sm:$0xff]  ;;  %vm131_vm0 = vcmask 130048   ;;  %vm1236_vm1 = vcmask 7168  }
   0x9   :  { %v47_v3 = vld [vmem:[%s2491_s1 + $0x30] sm:$0xff]  ;;  %170 = vmatpush.msra.mxu0 %v45_v1  ;;  %211 = vmatpush.msra.mxu1 %v46_v2  ;;  %v48_v4 = vld [vmem:[%s2491_s1 + $0x38] sm:$0xff]  ;;  %v41_v5 = vld [vmem:[%s2491_s1] sm:$0xff] }
   0xa   :  { %v42_v6 = vld [vmem:[%s2491_s1 + $0x8] sm:$0xff]  ;;  %252 = vmatpush.msra.mxu2 %v47_v3  ;;  %293 = vmatpush.msra.mxu3 %v48_v4  ;;  %v43_v7 = vld [vmem:[%s2491_s1 + $0x10] sm:$0xff]  ;;  %v44_v8 = vld [vmem:[%s2491_s1 + $0x18] sm:$0xff] }
   0xb   :  { %v114_v9 = vld [vmem:[%s2490_s0] sm:$0xff]  ;;  %171 = vmatpush.msra.mxu0 %v41_v5  ;;  %212 = vmatpush.msra.mxu1 %v42_v6  ;;  %v1532_v11 = vld [vmem:[#allocation4 + $0x1e8] sm:$0xff]  ;;  %v1536_v12 = vld [vmem:[#allocation4 + $0x1f0] sm:$0xff] }
   0xc   :  { %253 = vmatpush.msra.mxu2 %v43_v7  ;;  %294 = vmatpush.msra.mxu3 %v44_v8  ;;  %v1530_v10 = vld [vmem:[#allocation4 + $0x1e0] sm:$0xff]  ;;  %v1538_v13 = vld [vmem:[#allocation4 + $0x1f8] sm:$0xff]  ;;  %v1544_v15 = vld [vmem:[#allocation4 + $0x1c8] sm:$0xff] }
   0xd   :  { %1250 = vmatmul.msk.f32.vlgmr.msra.gmra.mxu0 %vm131_vm0, %v114_v9  ;;  %1258 = vmatmul.msk.f32.vlgmr.msra.gmra.mxu1 %vm131_vm0, %v114_v9  ;;  %v1542_v14 = vld [vmem:[#allocation4 + $0x1c0] sm:$0xff]  ;;  %v1548_v16 = vld [vmem:[#allocation4 + $0x1d0] sm:$0xff]  ;;  %v1550_v17 = vld [vmem:[#allocation4 + $0x1d8] sm:$0xff] }
   0xe   :  { %1266 = vmatmul.msk.f32.vlgmr.msra.gmra.mxu2 %vm131_vm0, %v114_v9  ;;  %1274 = vmatmul.msk.f32.vlgmr.msra.gmra.mxu3 %vm131_vm0, %v114_v9  ;;  %v1554_v18 = vld [vmem:[#allocation4 + $0x1a0] sm:$0xff]  ;;  %v1556_v19 = vld [vmem:[#allocation4 + $0x1a8] sm:$0xff]  ;;  %v1560_v20 = vld [vmem:[#allocation4 + $0x1b0] sm:$0xff] }
   0xf   :  { %359 = vmatpush.msrb.mxu0 %v1530_v10  ;;  %379 = vmatpush.msrb.mxu1 %v1532_v11  ;;  %v1562_v21 = vld [vmem:[#allocation4 + $0x1b8] sm:$0xff]  ;;  %v115_v22 = vld [vmem:[%s2490_s0 + $0x8] sm:$0xff]  ;;  %v1579_v25 = vld [vmem:[#allocation4 + $0x190] sm:$0xff] }
  0x10   :  { %399 = vmatpush.msrb.mxu2 %v1536_v12  ;;  %419 = vmatpush.msrb.mxu3 %v1538_v13  ;;  %v1572_v23 = vld [vmem:[#allocation4 + $0x180] sm:$0xff]  ;;  %v1574_v24 = vld [vmem:[#allocation4 + $0x188] sm:$0xff]  ;;  %v1581_v26 = vld [vmem:[#allocation4 + $0x198] sm:$0xff] }
  0x11   :  { %360 = vmatpush.msrb.mxu0 %v1542_v14  ;;  %380 = vmatpush.msrb.mxu1 %v1544_v15  ;;  %v1585_v27 = vld [vmem:[#allocation4 + $0x160] sm:$0xff]  ;;  %v1587_v28 = vld [vmem:[#allocation4 + $0x168] sm:$0xff]  ;;  %v1591_v29 = vld [vmem:[#allocation4 + $0x170] sm:$0xff] }
  0x12   :  { %400 = vmatpush.msrb.mxu2 %v1548_v16  ;;  %420 = vmatpush.msrb.mxu3 %v1550_v17  ;;  %v1593_v30 = vld [vmem:[#allocation4 + $0x178] sm:$0xff]  ;;  %v1597_v31 = vld [vmem:[#allocation4 + $0x140] sm:$0xff]  ;;  %v1599_v32 = vld [vmem:[#allocation4 + $0x148] sm:$0xff] }
  0x13   :  { %361 = vmatpush.msrb.mxu0 %v1554_v18  ;;  %381 = vmatpush.msrb.mxu1 %v1556_v19  ;;  %v1603_v33 = vld [vmem:[#allocation4 + $0x150] sm:$0xff]  ;;  %v1605_v34 = vld [vmem:[#allocation4 + $0x158] sm:$0xff]  ;;  %v1615_v36 = vld [vmem:[#allocation4 + $0x120] sm:$0xff] }
  0x14   :  { %401 = vmatpush.msrb.mxu2 %v1560_v20  ;;  %421 = vmatpush.msrb.mxu3 %v1562_v21  ;;  %v116_v35 = vld [vmem:[%s2490_s0 + $0x10] sm:$0xff]  ;;  %v1624_v39 = vld [vmem:[#allocation4 + $0x138] sm:$0xff]  ;;  %v1628_v40 = vld [vmem:[#allocation4 + $0x100] sm:$0xff] }
  0x15   :  { %1251 = vmatmul.msk.f32.gmra.mxu0 %vm131_vm0, %v115_v22  ;;  %1259 = vmatmul.msk.f32.gmra.mxu1 %vm131_vm0, %v115_v22  ;;  %v1617_v37 = vld [vmem:[#allocation4 + $0x128] sm:$0xff]  ;;  %v1622_v38 = vld [vmem:[#allocation4 + $0x130] sm:$0xff]  ;;  %v1636_v43 = vld [vmem:[#allocation4 + $0x118] sm:$0xff] }
  0x16   :  { %1267 = vmatmul.msk.f32.gmra.mxu2 %vm131_vm0, %v115_v22  ;;  %1275 = vmatmul.msk.f32.gmra.mxu3 %vm131_vm0, %v115_v22  ;;  %v1630_v41 = vld [vmem:[#allocation4 + $0x108] sm:$0xff]  ;;  %v1634_v42 = vld [vmem:[#allocation4 + $0x110] sm:$0xff]  ;;  %v1640_v44 = vld [vmem:[#allocation4 + $0xe0] sm:$0xff] }
  0x17   :  { %362 = vmatpush.msrb.mxu0 %v1572_v23  ;;  %382 = vmatpush.msrb.mxu1 %v1574_v24  ;;  %v1642_v45 = vld [vmem:[#allocation4 + $0xe8] sm:$0xff]  ;;  %v1646_v46 = vld [vmem:[#allocation4 + $0xf0] sm:$0xff]  ;;  %v1648_v47 = vld [vmem:[#allocation4 + $0xf8] sm:$0xff] }
  0x18   :  { %402 = vmatpush.msrb.mxu2 %v1579_v25  ;;  %422 = vmatpush.msrb.mxu3 %v1581_v26  ;;  %v117_v48 = vld [vmem:[%s2490_s0 + $0x18] sm:$0xff]  ;;  %v1658_v49 = vld [vmem:[#allocation4 + $0xc0] sm:$0xff]  ;;  %v1660_v50 = vld [vmem:[#allocation4 + $0xc8] sm:$0xff] }
  0x19   :  { %363 = vmatpush.msrb.mxu0 %v1585_v27  ;;  %383 = vmatpush.msrb.mxu1 %v1587_v28  ;;  %v1665_v51 = vld [vmem:[#allocation4 + $0xd0] sm:$0xff]  ;;  %v1667_v52 = vld [vmem:[#allocation4 + $0xd8] sm:$0xff]  ;;  %v1671_v53 = vld [vmem:[#allocation4 + $0xa0] sm:$0xff] }
  0x1a   :  { %403 = vmatpush.msrb.mxu2 %v1591_v29  ;;  %423 = vmatpush.msrb.mxu3 %v1593_v30  ;;  %2587 = vst [vmem:[#allocation7_spill] sm:$0xff] %v1671_v53  ;;  %v1673_v54 = vld [vmem:[#allocation4 + $0xa8] sm:$0xff]  ;;  %v1677_v55 = vld [vmem:[#allocation4 + $0xb0] sm:$0xff]  ;;  %v1679_v56 = vld [vmem:[#allocation4 + $0xb8] sm:$0xff] }
  0x1b   :  { %364 = vmatpush.msrb.mxu0 %v1597_v31  ;;  %384 = vmatpush.msrb.mxu1 %v1599_v32  ;;  %2588 = vst [vmem:[#allocation8_spill] sm:$0xff] %v1673_v54  ;;  %v1683_v57 = vld [vmem:[#allocation4 + $0x80] sm:$0xff]  ;;  %v1685_v58 = vld [vmem:[#allocation4 + $0x88] sm:$0xff]  ;;  %v1689_v59 = vld [vmem:[#allocation4 + $0x90] sm:$0xff] }
  0x1c   :  { %404 = vmatpush.msrb.mxu2 %v1603_v33  ;;  %424 = vmatpush.msrb.mxu3 %v1605_v34  ;;  %2589 = vst [vmem:[#allocation9_spill] sm:$0xff] %v1677_v55  ;;  %v1691_v60 = vld [vmem:[#allocation4 + $0x98] sm:$0xff]  ;;  %v1701_v62 = vld [vmem:[#allocation4 + $0x60] sm:$0xff]  ;;  %v1703_v63 = vld [vmem:[#allocation4 + $0x68] sm:$0xff] }
  0x1d   :  { %1252 = vmatmul.msk.f32.gmra.mxu0 %vm131_vm0, %v116_v35  ;;  %1260 = vmatmul.msk.f32.gmra.mxu1 %vm131_vm0, %v116_v35  ;;  %2590 = vst [vmem:[#allocation10_spill] sm:$0xff] %v1679_v56  ;;  %v118_v61 = vld [vmem:[%s2490_s0 + $0x20] sm:$0xff]  ;;  %v1708_v0 = vld [vmem:[#allocation4 + $0x70] sm:$0xff]  ;;  %v1716_v3 = vld [vmem:[#allocation4 + $0x48] sm:$0xff] }
  0x1e   :  { %1268 = vmatmul.msk.f32.gmra.mxu2 %vm131_vm0, %v116_v35  ;;  %1276 = vmatmul.msk.f32.gmra.mxu3 %vm131_vm0, %v116_v35  ;;  %2591 = vst [vmem:[#allocation11_spill] sm:$0xff] %v1683_v57  ;;  %v1710_v1 = vld [vmem:[#allocation4 + $0x78] sm:$0xff]  ;;  %v1714_v2 = vld [vmem:[#allocation4 + $0x40] sm:$0xff]  ;;  %v1720_v4 = vld [vmem:[#allocation4 + $0x50] sm:$0xff] }
  0x1f   :  { %365 = vmatpush.msrb.mxu0 %v1615_v36  ;;  %385 = vmatpush.msrb.mxu1 %v1617_v37  ;;  %2592 = vst [vmem:[#allocation12_spill] sm:$0xff] %v1685_v58  ;;  %v1722_v5 = vld [vmem:[#allocation4 + $0x58] sm:$0xff]  ;;  %v1726_v6 = vld [vmem:[#allocation4 + $0x20] sm:$0xff]  ;;  %v1728_v7 = vld [vmem:[#allocation4 + $0x28] sm:$0xff] }
  0x20   :  { %405 = vmatpush.msrb.mxu2 %v1622_v38  ;;  %425 = vmatpush.msrb.mxu3 %v1624_v39  ;;  %2593 = vst [vmem:[#allocation13_spill] sm:$0xff] %v1689_v59  ;;  %v1732_v8 = vld [vmem:[#allocation4 + $0x30] sm:$0xff]  ;;  %v1734_v9 = vld [vmem:[#allocation4 + $0x38] sm:$0xff]  ;;  %v119_v22 = vld [vmem:[%s2490_s0 + $0x28] sm:$0xff] }
  0x21   :  { %366 = vmatpush.msrb.mxu0 %v1628_v40  ;;  %386 = vmatpush.msrb.mxu1 %v1630_v41  ;;  %2594 = vst [vmem:[#allocation14_spill] sm:$0xff] %v1691_v60  ;;  %v1744_v35 = vld [vmem:[#allocation4] sm:$0xff] }
  0x22   :  { %406 = vmatpush.msrb.mxu2 %v1634_v42  ;;  %426 = vmatpush.msrb.mxu3 %v1636_v43  ;;  %2595 = vst [vmem:[#allocation15_spill] sm:$0xff] %v1701_v62 }
  0x23   :  { %367 = vmatpush.msrb.mxu0 %v1640_v44  ;;  %387 = vmatpush.msrb.mxu1 %v1642_v45  ;;  %2596 = vst [vmem:[#allocation16_spill] sm:$0xff] %v1703_v63 }
  0x24   :  { %407 = vmatpush.msrb.mxu2 %v1646_v46  ;;  %427 = vmatpush.msrb.mxu3 %v1648_v47  ;;  %2597 = vst [vmem:[#allocation17_spill] sm:$0xff] %v1708_v0 }
  0x25   :  { %1253 = vmatmul.msk.f32.gmra.mxu0 %vm131_vm0, %v117_v48  ;;  %1261 = vmatmul.msk.f32.gmra.mxu1 %vm131_vm0, %v117_v48  ;;  %2598 = vst [vmem:[#allocation18_spill] sm:$0xff] %v1710_v1 }
  0x26   :  { %1269 = vmatmul.msk.f32.gmra.mxu2 %vm131_vm0, %v117_v48  ;;  %1277 = vmatmul.msk.f32.gmra.mxu3 %vm131_vm0, %v117_v48  ;;  %2599 = vst [vmem:[#allocation19_spill] sm:$0xff] %v1714_v2  ;;  %v1746_v48 = vld [vmem:[#allocation4 + $0x8] sm:$0xff] }
  0x27   :  { %368 = vmatpush.msrb.mxu0 %v1658_v49  ;;  %388 = vmatpush.msrb.mxu1 %v1660_v50  ;;  %2600 = vst [vmem:[#allocation20_spill] sm:$0xff] %v1716_v3 }
  0x28   :  { %408 = vmatpush.msrb.mxu2 %v1665_v51  ;;  %428 = vmatpush.msrb.mxu3 %v1667_v52  ;;  %2601 = vst [vmem:[#allocation21_spill] sm:$0xff] %v1720_v4 }
  0x29   :  { %369 = vmatpush.msrb.mxu0 %v1671_v53  ;;  %389 = vmatpush.msrb.mxu1 %v1673_v54  ;;  %2602 = vst [vmem:[#allocation22_spill] sm:$0xff] %v1722_v5 }
  0x2a   :  { %409 = vmatpush.msrb.mxu2 %v1677_v55  ;;  %429 = vmatpush.msrb.mxu3 %v1679_v56  ;;  %2603 = vst [vmem:[#allocation23_spill] sm:$0xff] %v1726_v6 }
  0x2b   :  { %370 = vmatpush.msrb.mxu0 %v1683_v57  ;;  %390 = vmatpush.msrb.mxu1 %v1685_v58  ;;  %2604 = vst [vmem:[#allocation24_spill] sm:$0xff] %v1728_v7 }
  0x2c   :  { %410 = vmatpush.msrb.mxu2 %v1689_v59  ;;  %430 = vmatpush.msrb.mxu3 %v1691_v60  ;;  %2605 = vst [vmem:[#allocation25_spill] sm:$0xff] %v1732_v8 }
  0x2d   :  { %1254 = vmatmul.msk.f32.gmra.mxu0 %vm131_vm0, %v118_v61  ;;  %1262 = vmatmul.msk.f32.gmra.mxu1 %vm131_vm0, %v118_v61  ;;  %2606 = vst [vmem:[#allocation26_spill] sm:$0xff] %v1734_v9 }
  0x2e   :  { %1270 = vmatmul.msk.f32.gmra.mxu2 %vm131_vm0, %v118_v61  ;;  %1278 = vmatmul.msk.f32.gmra.mxu3 %vm131_vm0, %v118_v61  ;;  %2607 = vst [vmem:[#allocation27_spill] sm:$0xff] %v1744_v35  ;;  %v1751_v61 = vld [vmem:[#allocation4 + $0x10] sm:$0xff] }
  0x2f   :  { %371 = vmatpush.msrb.mxu0 %v1701_v62  ;;  %391 = vmatpush.msrb.mxu1 %v1703_v63  ;;  %2608 = vst [vmem:[#allocation28_spill] sm:$0xff] %v1746_v48 }
  0x30   :  { %411 = vmatpush.msrb.mxu2 %v1708_v0  ;;  %431 = vmatpush.msrb.mxu3 %v1710_v1  ;;  %2609 = vst [vmem:[#allocation29_spill] sm:$0xff] %v1751_v61 }
  0x31   :  { %372 = vmatpush.msrb.mxu0 %v1714_v2  ;;  %392 = vmatpush.msrb.mxu1 %v1716_v3 }
  0x32   :  { %412 = vmatpush.msrb.mxu2 %v1720_v4  ;;  %432 = vmatpush.msrb.mxu3 %v1722_v5  ;;  %v1753_v4 = vld [vmem:[#allocation4 + $0x18] sm:$0xff] }
  0x33   :  { %373 = vmatpush.msrb.mxu0 %v1726_v6  ;;  %393 = vmatpush.msrb.mxu1 %v1728_v7  ;;  %2610 = vst [vmem:[#allocation30_spill] sm:$0xff] %v1753_v4 }
  0x34   :  { %413 = vmatpush.msrb.mxu2 %v1732_v8  ;;  %433 = vmatpush.msrb.mxu3 %v1734_v9  ;;  %v120_v9 = vld [vmem:[%s2490_s0 + $0x30] sm:$0xff] }
  0x35   :  { %1255 = vmatmul.msk.f32.gmra.mxu0 %vm131_vm0, %v119_v22  ;;  %1263 = vmatmul.msk.f32.gmra.mxu1 %vm131_vm0, %v119_v22 }
  0x36   :  { %1271 = vmatmul.msk.f32.gmra.mxu2 %vm131_vm0, %v119_v22  ;;  %1279 = vmatmul.msk.f32.gmra.mxu3 %vm131_vm0, %v119_v22  ;;  %v121_v22 = vld [vmem:[%s2490_s0 + $0x38] sm:$0xff] }
  0x37   :  { %374 = vmatpush.msrb.mxu0 %v1744_v35  ;;  %394 = vmatpush.msrb.mxu1 %v1746_v48 }
  0x38   :  { %414 = vmatpush.msrb.mxu2 %v1751_v61  ;;  %434 = vmatpush.msrb.mxu3 %v1753_v4 }
  0x39   :  { %468 = vmatpush.msra.mxu0 %v1530_v10  ;;  %488 = vmatpush.msra.mxu1 %v1532_v11 }
  0x3a   :  { %508 = vmatpush.msra.mxu2 %v1536_v12  ;;  %528 = vmatpush.msra.mxu3 %v1538_v13 }
  0x3b   :  { %469 = vmatpush.msra.mxu0 %v1542_v14  ;;  %489 = vmatpush.msra.mxu1 %v1544_v15 }
  0x3c   :  { %509 = vmatpush.msra.mxu2 %v1548_v16  ;;  %529 = vmatpush.msra.mxu3 %v1550_v17 }
  0x3d   :  { %1256 = vmatmul.msk.f32.gmra.mxu0 %vm131_vm0, %v120_v9  ;;  %1264 = vmatmul.msk.f32.gmra.mxu1 %vm131_vm0, %v120_v9 }
  0x3e   :  { %1272 = vmatmul.msk.f32.gmra.mxu2 %vm131_vm0, %v120_v9  ;;  %1280 = vmatmul.msk.f32.gmra.mxu3 %vm131_vm0, %v120_v9  ;;  %v1461_v9 = vmov 0.0  }
  0x3f   :  { %470 = vmatpush.msra.mxu0 %v1554_v18  ;;  %490 = vmatpush.msra.mxu1 %v1556_v19 }
  0x40   :  { %510 = vmatpush.msra.mxu2 %v1560_v20  ;;  %530 = vmatpush.msra.mxu3 %v1562_v21 }
  0x41   :  { %471 = vmatpush.msra.mxu0 %v1572_v23  ;;  %491 = vmatpush.msra.mxu1 %v1574_v24 }
  0x42   :  { %511 = vmatpush.msra.mxu2 %v1579_v25  ;;  %531 = vmatpush.msra.mxu3 %v1581_v26 }
  0x43   :  { %472 = vmatpush.msra.mxu0 %v1585_v27  ;;  %492 = vmatpush.msra.mxu1 %v1587_v28 }
  0x44   :  { %512 = vmatpush.msra.mxu2 %v1591_v29  ;;  %532 = vmatpush.msra.mxu3 %v1593_v30 }
  0x45   :  { %1257 = vmatmul.msk.f32.gmra.mxu0 %vm131_vm0, %v121_v22  ;;  %1265 = vmatmul.msk.f32.gmra.mxu1 %vm131_vm0, %v121_v22 }
  0x46   :  { %1273 = vmatmul.msk.f32.gmra.mxu2 %vm131_vm0, %v121_v22  ;;  %1281 = vmatmul.msk.f32.gmra.mxu3 %vm131_vm0, %v121_v22  ;;  %v2611_v22 = vld [vmem:[#allocation21_spill] sm:$0xff] }
  0x47   :  { %473 = vmatpush.msra.mxu0 %v1597_v31  ;;  %493 = vmatpush.msra.mxu1 %v1599_v32 }
  0x48   :  { %513 = vmatpush.msra.mxu2 %v1603_v33  ;;  %533 = vmatpush.msra.mxu3 %v1605_v34 }
  0x49   :  { %474 = vmatpush.msra.mxu0 %v1615_v36  ;;  %494 = vmatpush.msra.mxu1 %v1617_v37 }
  0x4a   :  { %514 = vmatpush.msra.mxu2 %v1622_v38  ;;  %534 = vmatpush.msra.mxu3 %v1624_v39 }
  0x4b   :  { %475 = vmatpush.msra.mxu0 %v1628_v40  ;;  %495 = vmatpush.msra.mxu1 %v1630_v41 }
  0x4c   :  { %515 = vmatpush.msra.mxu2 %v1634_v42  ;;  %535 = vmatpush.msra.mxu3 %v1636_v43 }
  0x4d   :  { %375 = vmatmul.f32.vlgmr.msrb.gmra.mxu0 %v1461_v9  ;;  %395 = vmatmul.f32.vlgmr.msrb.gmra.mxu1 %v1461_v9 }
  0x4e   :  { %415 = vmatmul.f32.vlgmr.msrb.gmra.mxu2 %v1461_v9  ;;  %435 = vmatmul.f32.vlgmr.msrb.gmra.mxu3 %v1461_v9  ;;  %v2612_v9 = vld [vmem:[#allocation26_spill] sm:$0xff] }
  0x4f   :  { %476 = vmatpush.msra.mxu0 %v1640_v44  ;;  %496 = vmatpush.msra.mxu1 %v1642_v45 }
  0x50   :  { %516 = vmatpush.msra.mxu2 %v1646_v46  ;;  %536 = vmatpush.msra.mxu3 %v1648_v47 }
  0x51   :  { %477 = vmatpush.msra.mxu0 %v1658_v49  ;;  %497 = vmatpush.msra.mxu1 %v1660_v50 }
  0x52   :  { %517 = vmatpush.msra.mxu2 %v1665_v51  ;;  %537 = vmatpush.msra.mxu3 %v1667_v52 }
  0x53   :  { %478 = vmatpush.msra.mxu0 %v1671_v53  ;;  %498 = vmatpush.msra.mxu1 %v1673_v54 }
  0x54   :  { %518 = vmatpush.msra.mxu2 %v1677_v55  ;;  %538 = vmatpush.msra.mxu3 %v1679_v56 }
  0x55   :  { %479 = vmatpush.msra.mxu0 %v1683_v57  ;;  %499 = vmatpush.msra.mxu1 %v1685_v58 }
  0x56   :  { %519 = vmatpush.msra.mxu2 %v1689_v59  ;;  %539 = vmatpush.msra.mxu3 %v1691_v60 }
  0x57   :  { %480 = vmatpush.msra.mxu0 %v1701_v62  ;;  %500 = vmatpush.msra.mxu1 %v1703_v63 }
  0x58   :  { %520 = vmatpush.msra.mxu2 %v1708_v0  ;;  %540 = vmatpush.msra.mxu3 %v1710_v1 }
  0x59   :  { %481 = vmatpush.msra.mxu0 %v1714_v2  ;;  %501 = vmatpush.msra.mxu1 %v1716_v3 }
  0x5a   :  { %521 = vmatpush.msra.mxu2 %v2611_v22  ;;  %541 = vmatpush.msra.mxu3 %v1722_v5 }
  0x5b   :  { %482 = vmatpush.msra.mxu0 %v1726_v6  ;;  %502 = vmatpush.msra.mxu1 %v1728_v7 }
  0x5c   :  { %522 = vmatpush.msra.mxu2 %v1732_v8  ;;  %542 = vmatpush.msra.mxu3 %v2612_v9 }
  0x5d   :  { %483 = vmatpush.msra.mxu0 %v1744_v35  ;;  %503 = vmatpush.msra.mxu1 %v1746_v48 }
  0x5e   :  { %523 = vmatpush.msra.mxu2 %v1751_v61  ;;  %543 = vmatpush.msra.mxu3 %v1753_v4 }
  0x5f   :  { %577 = vmatpush.msrb.mxu0 %v1530_v10  ;;  %597 = vmatpush.msrb.mxu1 %v1532_v11 }
  0x60   :  { %617 = vmatpush.msrb.mxu2 %v1536_v12  ;;  %637 = vmatpush.msrb.mxu3 %v1538_v13 }
  0x61   :  { %578 = vmatpush.msrb.mxu0 %v1542_v14  ;;  %598 = vmatpush.msrb.mxu1 %v1544_v15 }
  0x62   :  { %618 = vmatpush.msrb.mxu2 %v1548_v16  ;;  %638 = vmatpush.msrb.mxu3 %v1550_v17 }
  0x63   :  { %579 = vmatpush.msrb.mxu0 %v1554_v18  ;;  %599 = vmatpush.msrb.mxu1 %v1556_v19 }
  0x64   :  { %619 = vmatpush.msrb.mxu2 %v1560_v20  ;;  %639 = vmatpush.msrb.mxu3 %v1562_v21 }
  0x65   :  { %580 = vmatpush.msrb.mxu0 %v1572_v23  ;;  %600 = vmatpush.msrb.mxu1 %v1574_v24 }
  0x66   :  { %620 = vmatpush.msrb.mxu2 %v1579_v25  ;;  %640 = vmatpush.msrb.mxu3 %v1581_v26 }
  0x67   :  { %581 = vmatpush.msrb.mxu0 %v1585_v27  ;;  %601 = vmatpush.msrb.mxu1 %v1587_v28 }
  0x68   :  { %621 = vmatpush.msrb.mxu2 %v1591_v29  ;;  %641 = vmatpush.msrb.mxu3 %v1593_v30 }
  0x69   :  { %582 = vmatpush.msrb.mxu0 %v1597_v31  ;;  %602 = vmatpush.msrb.mxu1 %v1599_v32 }
  0x6a   :  { %622 = vmatpush.msrb.mxu2 %v1603_v33  ;;  %642 = vmatpush.msrb.mxu3 %v1605_v34 }
  0x6b   :  { %583 = vmatpush.msrb.mxu0 %v1615_v36  ;;  %603 = vmatpush.msrb.mxu1 %v1617_v37 }
  0x6c   :  { %623 = vmatpush.msrb.mxu2 %v1622_v38  ;;  %643 = vmatpush.msrb.mxu3 %v1624_v39 }
  0x6d   :  { %584 = vmatpush.msrb.mxu0 %v1628_v40  ;;  %604 = vmatpush.msrb.mxu1 %v1630_v41 }
  0x6e   :  { %624 = vmatpush.msrb.mxu2 %v1634_v42  ;;  %644 = vmatpush.msrb.mxu3 %v1636_v43 }
  0x6f   :  { %585 = vmatpush.msrb.mxu0 %v1640_v44  ;;  %605 = vmatpush.msrb.mxu1 %v1642_v45 }
  0x70   :  { %625 = vmatpush.msrb.mxu2 %v1646_v46  ;;  %645 = vmatpush.msrb.mxu3 %v1648_v47 }
  0x71   :  { %586 = vmatpush.msrb.mxu0 %v1658_v49  ;;  %606 = vmatpush.msrb.mxu1 %v1660_v50 }
  0x72   :  { %626 = vmatpush.msrb.mxu2 %v1665_v51  ;;  %646 = vmatpush.msrb.mxu3 %v1667_v52 }
  0x73   :  { %587 = vmatpush.msrb.mxu0 %v1671_v53  ;;  %607 = vmatpush.msrb.mxu1 %v1673_v54 }
  0x74   :  { %627 = vmatpush.msrb.mxu2 %v1677_v55  ;;  %647 = vmatpush.msrb.mxu3 %v1679_v56 }
  0x75   :  { %588 = vmatpush.msrb.mxu0 %v1683_v57  ;;  %608 = vmatpush.msrb.mxu1 %v1685_v58 }
  0x76   :  { %628 = vmatpush.msrb.mxu2 %v1689_v59  ;;  %648 = vmatpush.msrb.mxu3 %v1691_v60 }
  0x77   :  { %589 = vmatpush.msrb.mxu0 %v1701_v62  ;;  %609 = vmatpush.msrb.mxu1 %v1703_v63 }
  0x78   :  { %629 = vmatpush.msrb.mxu2 %v1708_v0  ;;  %649 = vmatpush.msrb.mxu3 %v1710_v1 }
  0x79   :  { %590 = vmatpush.msrb.mxu0 %v1714_v2  ;;  %610 = vmatpush.msrb.mxu1 %v1716_v3 }
  0x7a   :  { %630 = vmatpush.msrb.mxu2 %v2611_v22  ;;  %650 = vmatpush.msrb.mxu3 %v1722_v5 }
  0x7b   :  { %591 = vmatpush.msrb.mxu0 %v1726_v6  ;;  %611 = vmatpush.msrb.mxu1 %v1728_v7  ;;  %v113_v6 = vld [vmem:[%s2493_s3] sm:$0xf] }
  0x7c   :  { %631 = vmatpush.msrb.mxu2 %v1732_v8  ;;  %651 = vmatpush.msrb.mxu3 %v2612_v9  ;;  %v123_v5 = vperm.slane %v113_v6, 0  ;;  %v124_v7 = vperm.slane %v113_v6, 1 }
  0x7d   :  { %592 = vmatpush.msrb.mxu0 %v1744_v35  ;;  %612 = vmatpush.msrb.mxu1 %v1746_v48 }
  0x7e   :  { %632 = vmatpush.msrb.mxu2 %v1751_v61  ;;  %652 = vmatpush.msrb.mxu3 %v1753_v4  ;;  %v1914_v61 = vperm.slane %v113_v6, 2  ;;  %v1916_v4 = vperm.slane %v113_v6, 3 }
  0x8a   :  { %v173_v3 = vpop.f32.mrf.mxu0  ;;  %v214_v22 = vpop.f32.mrf.mxu1 }
  0x91   :  { %v1906_v2 = vpop.f32.mrf.mxu2  ;;  %v1908_v8 = vpop.f32.mrf.mxu3 }
  0x92   :  { %v176_v9 = vpop.f32.mrf.mxu0  ;;  %v217_v35 = vpop.f32.mrf.mxu1 }
  0x93   :  { %v1910_v1 = vadd.f32 %v176_v9, %v123_v5  ;;  %v1912_v48 = vadd.f32 %v217_v35, %v124_v7 }
  0x95   :  { %2613 = vst [vmem:[#allocation31_spill] sm:$0xff] %v1910_v1 }
  0x96   :  { %2614 = vst [vmem:[#allocation32_spill] sm:$0xff] %v1912_v48 }
  0x99   :  { %v258_v0 = vpop.f32.mrf.mxu2  ;;  %v299_v63 = vpop.f32.mrf.mxu3 }
  0x9a   :  { %v1919_v62 = vadd.f32 %v258_v0, %v1914_v61  ;;  %v1922_v60 = vadd.f32 %v299_v63, %v1916_v4  ;;  %v179_v59 = vpop.f32.mrf.mxu0  ;;  %v220_v58 = vpop.f32.mrf.mxu1 }
  0x9b   :  { %v1924_v57 = vadd.f32 %v179_v59, %v123_v5  ;;  %v1926_v9 = vadd.f32 %v220_v58, %v124_v7 }
  0x9c   :  { %2615 = vst [vmem:[#allocation33_spill] sm:$0xff] %v1919_v62 }
  0x9d   :  { %2616 = vst [vmem:[#allocation34_spill] sm:$0xff] %v1922_v60 }
  0x9e   :  { %2617 = vst [vmem:[#allocation35_spill] sm:$0xff] %v1924_v57 }
  0x9f   :  { %2618 = vst [vmem:[#allocation36_spill] sm:$0xff] %v1926_v9 }
  0xa1   :  { %v261_v35 = vpop.f32.mrf.mxu2  ;;  %v302_v48 = vpop.f32.mrf.mxu3 }
  0xa2   :  { %v1929_v1 = vadd.f32 %v261_v35, %v1914_v61  ;;  %v1932_v6 = vadd.f32 %v302_v48, %v1916_v4  ;;  %v182_v56 = vpop.f32.mrf.mxu0  ;;  %v223_v0 = vpop.f32.mrf.mxu1 }
  0xa3   :  { %v1934_v62 = vadd.f32 %v182_v56, %v123_v5  ;;  %v1936_v63 = vadd.f32 %v223_v0, %v124_v7 }
  0xa4   :  { %2619 = vst [vmem:[#allocation37_spill] sm:$0xff] %v1929_v1 }
  0xa5   :  { %2620 = vst [vmem:[#allocation38_spill] sm:$0xff] %v1932_v6 }
  0xa6   :  { %2621 = vst [vmem:[#allocation39_spill] sm:$0xff] %v1934_v62 }
  0xa7   :  { %2622 = vst [vmem:[#allocation40_spill] sm:$0xff] %v1936_v63 }
  0xa9   :  { %v264_v60 = vpop.f32.mrf.mxu2  ;;  %v305_v55 = vpop.f32.mrf.mxu3 }
  0xaa   :  { %v1939_v59 = vadd.f32 %v264_v60, %v1914_v61  ;;  %v1942_v58 = vadd.f32 %v305_v55, %v1916_v4  ;;  %v185_v9 = vpop.f32.mrf.mxu0  ;;  %v226_v35 = vpop.f32.mrf.mxu1 }
  0xab   :  { %v1944_v1 = vadd.f32 %v185_v9, %v123_v5  ;;  %v1946_v48 = vadd.f32 %v226_v35, %v124_v7 }
  0xac   :  { %2623 = vst [vmem:[#allocation41_spill] sm:$0xff] %v1939_v59 }
  0xad   :  { %2624 = vst [vmem:[#allocation42_spill] sm:$0xff] %v1942_v58 }
  0xae   :  { %2625 = vst [vmem:[#allocation43_spill] sm:$0xff] %v1944_v1 }
  0xaf   :  { %2626 = vst [vmem:[#allocation44_spill] sm:$0xff] %v1946_v48 }
  0xb1   :  { %v267_v6 = vpop.f32.mrf.mxu2  ;;  %v308_v57 = vpop.f32.mrf.mxu3 }
  0xb2   :  { %v1949_v56 = vadd.f32 %v267_v6, %v1914_v61  ;;  %v1952_v0 = vadd.f32 %v308_v57, %v1916_v4  ;;  %v188_v63 = vpop.f32.mrf.mxu0  ;;  %v229_v60 = vpop.f32.mrf.mxu1 }
  0xb3   :  { %v1954_v59 = vadd.f32 %v188_v63, %v123_v5  ;;  %v1956_v55 = vadd.f32 %v229_v60, %v124_v7 }
  0xb4   :  { %2627 = vst [vmem:[#allocation45_spill] sm:$0xff] %v1949_v56 }
  0xb5   :  { %2628 = vst [vmem:[#allocation46_spill] sm:$0xff] %v1952_v0 }
  0xb6   :  { %2629 = vst [vmem:[#allocation47_spill] sm:$0xff] %v1954_v59  ;;  %v215_v59 = vadd.f32 %v214_v22, %v124_v7 }
  0xb7   :  { %2630 = vst [vmem:[#allocation48_spill] sm:$0xff] %v1956_v55 }
  0xb9   :  { %v270_v58 = vpop.f32.mrf.mxu2  ;;  %v311_v62 = vpop.f32.mrf.mxu3 }
  0xba   :  { %v1959_v9 = vadd.f32 %v270_v58, %v1914_v61  ;;  %v1962_v35 = vadd.f32 %v311_v62, %v1916_v4  ;;  %v191_v48 = vpop.f32.mrf.mxu0  ;;  %v232_v6 = vpop.f32.mrf.mxu1 }
  0xbb   :  { %v1964_v56 = vadd.f32 %v191_v48, %v123_v5  ;;  %v1966_v57 = vadd.f32 %v232_v6, %v124_v7 }
  0xbc   :  { %2631 = vst [vmem:[#allocation49_spill] sm:$0xff] %v1959_v9 }
  0xbd   :  { %2632 = vst [vmem:[#allocation50_spill] sm:$0xff] %v1962_v35  ;;  %v174_v35 = vadd.f32 %v173_v3, %v123_v5  ;;  %v297_v3 = vadd.f32 %v1908_v8, %v1916_v4 }
  0xbe   :  { %2633 = vst [vmem:[#allocation51_spill] sm:$0xff] %v1964_v56 }
  0xbf   :  { %2634 = vst [vmem:[#allocation52_spill] sm:$0xff] %v1966_v57 }
  0xc1   :  { %v273_v0 = vpop.f32.mrf.mxu2  ;;  %v314_v1 = vpop.f32.mrf.mxu3 }
  0xc2   :  { %v1969_v63 = vadd.f32 %v273_v0, %v1914_v61  ;;  %v1972_v60 = vadd.f32 %v314_v1, %v1916_v4  ;;  %v194_v55 = vpop.f32.mrf.mxu0  ;;  %v235_v58 = vpop.f32.mrf.mxu1 }
  0xc3   :  { %v1974_v9 = vadd.f32 %v194_v55, %v123_v5  ;;  %v1976_v62 = vadd.f32 %v235_v58, %v124_v7  ;;  %v256_v55 = vadd.f32 %v1906_v2, %v1914_v61 }
  0xc4   :  { %2635 = vst [vmem:[#allocation53_spill] sm:$0xff] %v1969_v63 }
  0xc5   :  { %2636 = vst [vmem:[#allocation54_spill] sm:$0xff] %v1972_v60 }
  0xc6   :  { %2637 = vst [vmem:[#allocation55_spill] sm:$0xff] %v1974_v9  ;;  %v2663_v9 = vld [vmem:[#allocation29_spill] sm:$0xff] }
  0xc7   :  { %2638 = vst [vmem:[#allocation56_spill] sm:$0xff] %v1976_v62  ;;  %v2662_v62 = vld [vmem:[#allocation28_spill] sm:$0xff] }
  0xc9   :  { %v276_v48 = vpop.f32.mrf.mxu2  ;;  %v317_v56 = vpop.f32.mrf.mxu3 }
  0xca   :  { %v1979_v6 = vadd.f32 %v276_v48, %v1914_v61  ;;  %v1982_v57 = vadd.f32 %v317_v56, %v1916_v4  ;;  %v376_v0 = vpop.f32.mrf.mxu0  ;;  %v396_v63 = vpop.f32.mrf.mxu1 }
  0xcb   :  { %v439_v1 = vadd.f32 %v376_v0, %v174_v35  ;;  %v440_v60 = vadd.f32 %v396_v63, %v215_v59 }
  0xcc   :  { %2639 = vst [vmem:[#allocation57_spill] sm:$0xff] %v1979_v6  ;;  %v2661_v6 = vld [vmem:[#allocation27_spill] sm:$0xff] }
  0xcd   :  { %2640 = vst [vmem:[#allocation58_spill] sm:$0xff] %v1982_v57  ;;  %v443_v54 = vmul.f32 0.5, %v439_v1  ;;  %v447_v53 = vmul.f32 0.5, %v440_v60 }
  0xcf   :  { %1288 = vtanh.f32 %v443_v54 }
  0xd0   :  { %1290 = vtanh.f32 %v447_v53 }
  0xd1   :  { %v416_v5 = vpop.f32.mrf.mxu2  ;;  %v436_v7 = vpop.f32.mrf.mxu3 }
  0xd2   :  { %v441_v22 = vadd.f32 %v416_v5, %v256_v55  ;;  %v442_v58 = vadd.f32 %v436_v7, %v297_v3  ;;  %v2642_v3 = vld [vmem:[#allocation8_spill] sm:$0xff]  ;;  %v2643_v5 = vld [vmem:[#allocation9_spill] sm:$0xff]  ;;  %v2644_v7 = vld [vmem:[#allocation10_spill] sm:$0xff] }
  0xd4   :  { %1292 = vtanh.f32 %v441_v22  ;;  %v452_v56 = vmul.f32 0.5, %v442_v58  ;;  %v2645_v22 = vld [vmem:[#allocation11_spill] sm:$0xff]  ;;  %v2646_v58 = vld [vmem:[#allocation12_spill] sm:$0xff] }
  0xd5   :  { %v1289_v48 = vpop.eup %1288 }
  0xd6   :  { %v1291_v57 = vpop.eup %1290  ;;  %v445_v35 = vmul.f32 0.5, %v1289_v48  ;;  %1294 = vtanh.f32 %v452_v56  ;;  %v2647_v56 = vld [vmem:[#allocation13_spill] sm:$0xff]  ;;  %v2648_v48 = vld [vmem:[#allocation14_spill] sm:$0xff] }
  0xd7   :  { %v449_v59 = vmul.f32 0.5, %v1291_v57  ;;  %v2641_v57 = vld [vmem:[#allocation7_spill] sm:$0xff] }
  0xd8   :  { %v446_v63 = vadd.f32 0.5, %v445_v35  ;;  %v2649_v35 = vld [vmem:[#allocation15_spill] sm:$0xff] }
  0xd9   :  { %v450_v54 = vadd.f32 0.5, %v449_v59  ;;  %v2650_v59 = vld [vmem:[#allocation16_spill] sm:$0xff] }
  0xda   :  { %v1293_v60 = vpop.eup %1292 }
  0xdb   :  { %v456_v0 = vmul.f32 0.0, %v450_v54  ;;  %v457_v2 = vmul.f32 %v1293_v60, %v446_v63  ;;  %v2651_v63 = vld [vmem:[#allocation17_spill] sm:$0xff]  ;;  %v2652_v54 = vld [vmem:[#allocation18_spill] sm:$0xff]  ;;  %v2653_v60 = vld [vmem:[#allocation19_spill] sm:$0xff] }
  0xdc   :  { %v1295_v61 = vpop.eup %1294 }
  0xdd   :  { %v1988_v1 = vadd.f32 %v457_v2, %v456_v0  ;;  %v454_v53 = vmul.f32 0.5, %v1295_v61  ;;  %v2654_v0 = vld [vmem:[#allocation20_spill] sm:$0xff]  ;;  %v2655_v2 = vld [vmem:[#allocation21_spill] sm:$0xff]  ;;  %v2656_v61 = vld [vmem:[#allocation22_spill] sm:$0xff] }
  0xdf   :  { %1296 = vtanh.f32 %v1988_v1  ;;  %v455_v4 = vadd.f32 0.5, %v454_v53  ;;  %v2657_v53 = vld [vmem:[#allocation23_spill] sm:$0xff] }
  0xe5   :  { %v1297_v8 = vpop.eup %1296 }
  0xe6   :  { %v460_v55 = vmul.f32 %v1297_v8, %v455_v4  ;;  %v2658_v4 = vld [vmem:[#allocation24_spill] sm:$0xff]  ;;  %v2659_v8 = vld [vmem:[#allocation25_spill] sm:$0xff] }
  0xe8   :  { %484 = vmatmul.f32.vlgmr.msra.gmra.mxu0 %v460_v55  ;;  %504 = vmatmul.f32.vlgmr.msra.gmra.mxu1 %v460_v55 }
  0xe9   :  { %524 = vmatmul.f32.vlgmr.msra.gmra.mxu2 %v460_v55  ;;  %544 = vmatmul.f32.vlgmr.msra.gmra.mxu3 %v460_v55  ;;  %v2660_v55 = vld [vmem:[#allocation26_spill] sm:$0xff] }
  0xea   :  { %686 = vmatpush.msra.mxu0 %v1530_v10  ;;  %706 = vmatpush.msra.mxu1 %v1532_v11 }
  0xeb   :  { %726 = vmatpush.msra.mxu2 %v1536_v12  ;;  %746 = vmatpush.msra.mxu3 %v1538_v13 }
  0xec   :  { %687 = vmatpush.msra.mxu0 %v1542_v14  ;;  %707 = vmatpush.msra.mxu1 %v1544_v15 }
  0xed   :  { %727 = vmatpush.msra.mxu2 %v1548_v16  ;;  %747 = vmatpush.msra.mxu3 %v1550_v17 }
  0xee   :  { %688 = vmatpush.msra.mxu0 %v1554_v18  ;;  %708 = vmatpush.msra.mxu1 %v1556_v19 }
  0xef   :  { %728 = vmatpush.msra.mxu2 %v1560_v20  ;;  %748 = vmatpush.msra.mxu3 %v1562_v21 }
  0xf0   :  { %689 = vmatpush.msra.mxu0 %v1572_v23  ;;  %709 = vmatpush.msra.mxu1 %v1574_v24 }
  0xf1   :  { %729 = vmatpush.msra.mxu2 %v1579_v25  ;;  %749 = vmatpush.msra.mxu3 %v1581_v26 }
  0xf2   :  { %690 = vmatpush.msra.mxu0 %v1585_v27  ;;  %710 = vmatpush.msra.mxu1 %v1587_v28 }
  0xf3   :  { %730 = vmatpush.msra.mxu2 %v1591_v29  ;;  %750 = vmatpush.msra.mxu3 %v1593_v30 }
  0xf4   :  { %691 = vmatpush.msra.mxu0 %v1597_v31  ;;  %711 = vmatpush.msra.mxu1 %v1599_v32 }
  0xf5   :  { %731 = vmatpush.msra.mxu2 %v1603_v33  ;;  %751 = vmatpush.msra.mxu3 %v1605_v34 }
  0xf6   :  { %692 = vmatpush.msra.mxu0 %v1615_v36  ;;  %712 = vmatpush.msra.mxu1 %v1617_v37 }
  0xf7   :  { %732 = vmatpush.msra.mxu2 %v1622_v38  ;;  %752 = vmatpush.msra.mxu3 %v1624_v39 }
  0xf8   :  { %693 = vmatpush.msra.mxu0 %v1628_v40  ;;  %713 = vmatpush.msra.mxu1 %v1630_v41 }
  0xf9   :  { %733 = vmatpush.msra.mxu2 %v1634_v42  ;;  %753 = vmatpush.msra.mxu3 %v1636_v43 }
  0xfa   :  { %694 = vmatpush.msra.mxu0 %v1640_v44  ;;  %714 = vmatpush.msra.mxu1 %v1642_v45 }
  0xfb   :  { %734 = vmatpush.msra.mxu2 %v1646_v46  ;;  %754 = vmatpush.msra.mxu3 %v1648_v47 }
  0xfc   :  { %695 = vmatpush.msra.mxu0 %v1658_v49  ;;  %715 = vmatpush.msra.mxu1 %v1660_v50 }
  0xfd   :  { %735 = vmatpush.msra.mxu2 %v1665_v51  ;;  %755 = vmatpush.msra.mxu3 %v1667_v52 }
  0xfe   :  { %696 = vmatpush.msra.mxu0 %v2641_v57  ;;  %716 = vmatpush.msra.mxu1 %v2642_v3 }
  0xff   :  { %736 = vmatpush.msra.mxu2 %v2643_v5  ;;  %756 = vmatpush.msra.mxu3 %v2644_v7 }
 0x100   :  { %697 = vmatpush.msra.mxu0 %v2645_v22  ;;  %717 = vmatpush.msra.mxu1 %v2646_v58 }
 0x101   :  { %737 = vmatpush.msra.mxu2 %v2647_v56  ;;  %757 = vmatpush.msra.mxu3 %v2648_v48  ;;  %v2668_v48 = vld [vmem:[#allocation34_spill] sm:$0xff] }
 0x102   :  { %698 = vmatpush.msra.mxu0 %v2649_v35  ;;  %718 = vmatpush.msra.mxu1 %v2650_v59  ;;  %v2667_v35 = vld [vmem:[#allocation33_spill] sm:$0xff] }
 0x103   :  { %738 = vmatpush.msra.mxu2 %v2651_v63  ;;  %758 = vmatpush.msra.mxu3 %v2652_v54  ;;  %v2665_v54 = vld [vmem:[#allocation31_spill] sm:$0xff]  ;;  %v2666_v63 = vld [vmem:[#allocation32_spill] sm:$0xff] }
 0x104   :  { %699 = vmatpush.msra.mxu0 %v2653_v60  ;;  %719 = vmatpush.msra.mxu1 %v2654_v0  ;;  %v2664_v60 = vld [vmem:[#allocation30_spill] sm:$0xff] }
 0x105   :  { %739 = vmatpush.msra.mxu2 %v2655_v2  ;;  %759 = vmatpush.msra.mxu3 %v2656_v61 }
 0x106   :  { %700 = vmatpush.msra.mxu0 %v2657_v53  ;;  %720 = vmatpush.msra.mxu1 %v2658_v4 }
 0x107   :  { %740 = vmatpush.msra.mxu2 %v2659_v8  ;;  %760 = vmatpush.msra.mxu3 %v2660_v55 }
 0x108   :  { %701 = vmatpush.msra.mxu0 %v2661_v6  ;;  %721 = vmatpush.msra.mxu1 %v2662_v62 }
 0x109   :  { %741 = vmatpush.msra.mxu2 %v2663_v9  ;;  %761 = vmatpush.msra.mxu3 %v2664_v60 }
 0x165   :  { %v485_v0 = vpop.f32.mrf.mxu0  ;;  %v505_v2 = vpop.f32.mrf.mxu1 }
 0x166   :  { %v548_v61 = vadd.f32 %v485_v0, %v2665_v54  ;;  %v549_v53 = vadd.f32 %v505_v2, %v2666_v63 }
 0x168   :  { %v552_v59 = vmul.f32 0.5, %v548_v61  ;;  %v556_v4 = vmul.f32 0.5, %v549_v53 }
 0x16a   :  { %1298 = vtanh.f32 %v552_v59 }
 0x16b   :  { %1300 = vtanh.f32 %v556_v4  ;;  %v2135_v4 = vld [vmem:[#allocation4 + $0x1e0] sm:$0xff] }
 0x16c   :  { %v525_v8 = vpop.f32.mrf.mxu2  ;;  %v545_v55 = vpop.f32.mrf.mxu3 }
 0x16d   :  { %v550_v6 = vadd.f32 %v525_v8, %v2667_v35  ;;  %v551_v62 = vadd.f32 %v545_v55, %v2668_v48  ;;  %v2138_v8 = vld [vmem:[#allocation4 + $0x1e8] sm:$0xff]  ;;  %v2141_v55 = vld [vmem:[#allocation4 + $0x1f0] sm:$0xff] }
 0x16f   :  { %1302 = vtanh.f32 %v550_v6  ;;  %v561_v9 = vmul.f32 0.5, %v551_v62 }
 0x170   :  { %v1299_v56 = vpop.eup %1298 }
 0x171   :  { %v1301_v60 = vpop.eup %1300  ;;  %v554_v58 = vmul.f32 0.5, %v1299_v56  ;;  %1304 = vtanh.f32 %v561_v9 }
 0x172   :  { %v558_v22 = vmul.f32 0.5, %v1301_v60 }
 0x173   :  { %v555_v54 = vadd.f32 0.5, %v554_v58 }
 0x174   :  { %v559_v0 = vadd.f32 0.5, %v558_v22 }
 0x175   :  { %v1303_v63 = vpop.eup %1302 }
 0x176   :  { %v565_v2 = vmul.f32 %v559_v0, %v1988_v1  ;;  %v566_v59 = vmul.f32 %v1303_v63, %v555_v54  ;;  %v2144_v54 = vld [vmem:[#allocation4 + $0x1f8] sm:$0xff]  ;;  %v2147_v0 = vld [vmem:[#allocation4 + $0x1c0] sm:$0xff]  ;;  %v2150_v63 = vld [vmem:[#allocation4 + $0x1c8] sm:$0xff] }
 0x177   :  { %v1305_v61 = vpop.eup %1304 }
 0x178   :  { %v2060_v53 = vadd.f32 %v566_v59, %v565_v2  ;;  %v563_v35 = vmul.f32 0.5, %v1305_v61  ;;  %v2153_v2 = vld [vmem:[#allocation4 + $0x1d0] sm:$0xff]  ;;  %v2156_v59 = vld [vmem:[#allocation4 + $0x1d8] sm:$0xff]  ;;  %v2159_v61 = vld [vmem:[#allocation4 + $0x1a0] sm:$0xff] }
 0x17a   :  { %1306 = vtanh.f32 %v2060_v53  ;;  %v564_v48 = vadd.f32 0.5, %v563_v35  ;;  %v2165_v35 = vld [vmem:[#allocation4 + $0x1b0] sm:$0xff] }
 0x180   :  { %v1307_v6 = vpop.eup %1306 }
 0x181   :  { %v569_v62 = vmul.f32 %v1307_v6, %v564_v48  ;;  %v2168_v48 = vld [vmem:[#allocation4 + $0x1b8] sm:$0xff]  ;;  %v2171_v6 = vld [vmem:[#allocation4 + $0x180] sm:$0xff] }
 0x183   :  { %593 = vmatmul.f32.vlgmr.msrb.gmra.mxu0 %v569_v62  ;;  %613 = vmatmul.f32.vlgmr.msrb.gmra.mxu1 %v569_v62 }
 0x184   :  { %633 = vmatmul.f32.vlgmr.msrb.gmra.mxu2 %v569_v62  ;;  %653 = vmatmul.f32.vlgmr.msrb.gmra.mxu3 %v569_v62  ;;  %v2174_v62 = vld [vmem:[#allocation4 + $0x188] sm:$0xff] }
 0x185   :  { %795 = vmatpush.msrb.mxu0 %v1530_v10  ;;  %815 = vmatpush.msrb.mxu1 %v1532_v11  ;;  %v2669_v10 = vld [vmem:[#allocation11_spill] sm:$0xff]  ;;  %v2670_v11 = vld [vmem:[#allocation12_spill] sm:$0xff] }
 0x186   :  { %835 = vmatpush.msrb.mxu2 %v1536_v12  ;;  %855 = vmatpush.msrb.mxu3 %v1538_v13  ;;  %v2671_v12 = vld [vmem:[#allocation13_spill] sm:$0xff]  ;;  %v2672_v13 = vld [vmem:[#allocation14_spill] sm:$0xff] }
 0x187   :  { %796 = vmatpush.msrb.mxu0 %v1542_v14  ;;  %816 = vmatpush.msrb.mxu1 %v1544_v15  ;;  %v2673_v14 = vld [vmem:[#allocation15_spill] sm:$0xff]  ;;  %v2674_v15 = vld [vmem:[#allocation16_spill] sm:$0xff] }
 0x188   :  { %836 = vmatpush.msrb.mxu2 %v1548_v16  ;;  %856 = vmatpush.msrb.mxu3 %v1550_v17  ;;  %v2675_v16 = vld [vmem:[#allocation17_spill] sm:$0xff]  ;;  %v2676_v17 = vld [vmem:[#allocation18_spill] sm:$0xff] }
 0x189   :  { %797 = vmatpush.msrb.mxu0 %v1554_v18  ;;  %817 = vmatpush.msrb.mxu1 %v1556_v19  ;;  %v2677_v18 = vld [vmem:[#allocation19_spill] sm:$0xff]  ;;  %v2678_v19 = vld [vmem:[#allocation20_spill] sm:$0xff] }
 0x18a   :  { %837 = vmatpush.msrb.mxu2 %v1560_v20  ;;  %857 = vmatpush.msrb.mxu3 %v1562_v21  ;;  %v2679_v20 = vld [vmem:[#allocation21_spill] sm:$0xff]  ;;  %v2680_v21 = vld [vmem:[#allocation22_spill] sm:$0xff] }
 0x18b   :  { %798 = vmatpush.msrb.mxu0 %v1572_v23  ;;  %818 = vmatpush.msrb.mxu1 %v1574_v24  ;;  %v2681_v23 = vld [vmem:[#allocation23_spill] sm:$0xff]  ;;  %v2682_v24 = vld [vmem:[#allocation24_spill] sm:$0xff] }
 0x18c   :  { %838 = vmatpush.msrb.mxu2 %v1579_v25  ;;  %858 = vmatpush.msrb.mxu3 %v1581_v26  ;;  %v2683_v25 = vld [vmem:[#allocation25_spill] sm:$0xff]  ;;  %v2684_v26 = vld [vmem:[#allocation26_spill] sm:$0xff] }
 0x18d   :  { %799 = vmatpush.msrb.mxu0 %v1585_v27  ;;  %819 = vmatpush.msrb.mxu1 %v1587_v28  ;;  %v2685_v27 = vld [vmem:[#allocation27_spill] sm:$0xff]  ;;  %v2686_v28 = vld [vmem:[#allocation28_spill] sm:$0xff] }
 0x18e   :  { %839 = vmatpush.msrb.mxu2 %v1591_v29  ;;  %859 = vmatpush.msrb.mxu3 %v1593_v30  ;;  %v2687_v29 = vld [vmem:[#allocation29_spill] sm:$0xff]  ;;  %v2688_v30 = vld [vmem:[#allocation30_spill] sm:$0xff] }
 0x18f   :  { %800 = vmatpush.msrb.mxu0 %v1597_v31  ;;  %820 = vmatpush.msrb.mxu1 %v1599_v32 }
 0x190   :  { %840 = vmatpush.msrb.mxu2 %v1603_v33  ;;  %860 = vmatpush.msrb.mxu3 %v1605_v34  ;;  %v2689_v33 = vld [vmem:[#allocation35_spill] sm:$0xff] }
 0x191   :  { %801 = vmatpush.msrb.mxu0 %v1615_v36  ;;  %821 = vmatpush.msrb.mxu1 %v1617_v37  ;;  %v2690_v36 = vld [vmem:[#allocation36_spill] sm:$0xff] }
 0x192   :  { %841 = vmatpush.msrb.mxu2 %v1622_v38  ;;  %861 = vmatpush.msrb.mxu3 %v1624_v39 }
 0x193   :  { %802 = vmatpush.msrb.mxu0 %v1628_v40  ;;  %822 = vmatpush.msrb.mxu1 %v1630_v41 }
 0x194   :  { %842 = vmatpush.msrb.mxu2 %v1634_v42  ;;  %862 = vmatpush.msrb.mxu3 %v1636_v43  ;;  %v2691_v42 = vld [vmem:[#allocation37_spill] sm:$0xff] }
 0x195   :  { %803 = vmatpush.msrb.mxu0 %v1640_v44  ;;  %823 = vmatpush.msrb.mxu1 %v1642_v45  ;;  %v2692_v44 = vld [vmem:[#allocation38_spill] sm:$0xff] }
 0x196   :  { %843 = vmatpush.msrb.mxu2 %v1646_v46  ;;  %863 = vmatpush.msrb.mxu3 %v1648_v47 }
 0x197   :  { %804 = vmatpush.msrb.mxu0 %v1658_v49  ;;  %824 = vmatpush.msrb.mxu1 %v1660_v50 }
 0x198   :  { %844 = vmatpush.msrb.mxu2 %v1665_v51  ;;  %864 = vmatpush.msrb.mxu3 %v1667_v52 }
 0x199   :  { %805 = vmatpush.msrb.mxu0 %v2641_v57  ;;  %825 = vmatpush.msrb.mxu1 %v2642_v3 }
 0x19a   :  { %845 = vmatpush.msrb.mxu2 %v2643_v5  ;;  %865 = vmatpush.msrb.mxu3 %v2644_v7 }
 0x19b   :  { %806 = vmatpush.msrb.mxu0 %v2669_v10  ;;  %826 = vmatpush.msrb.mxu1 %v2670_v11  ;;  %v2177_v10 = vld [vmem:[#allocation4 + $0x190] sm:$0xff]  ;;  %v2180_v11 = vld [vmem:[#allocation4 + $0x198] sm:$0xff] }
 0x19c   :  { %846 = vmatpush.msrb.mxu2 %v2671_v12  ;;  %866 = vmatpush.msrb.mxu3 %v2672_v13  ;;  %v2183_v12 = vld [vmem:[#allocation4 + $0x160] sm:$0xff]  ;;  %v2186_v13 = vld [vmem:[#allocation4 + $0x168] sm:$0xff] }
 0x19d   :  { %807 = vmatpush.msrb.mxu0 %v2673_v14  ;;  %827 = vmatpush.msrb.mxu1 %v2674_v15  ;;  %v2189_v14 = vld [vmem:[#allocation4 + $0x170] sm:$0xff]  ;;  %v2192_v15 = vld [vmem:[#allocation4 + $0x178] sm:$0xff] }
 0x19e   :  { %847 = vmatpush.msrb.mxu2 %v2675_v16  ;;  %867 = vmatpush.msrb.mxu3 %v2676_v17  ;;  %v2195_v16 = vld [vmem:[#allocation4 + $0x140] sm:$0xff]  ;;  %v2198_v17 = vld [vmem:[#allocation4 + $0x148] sm:$0xff] }
 0x19f   :  { %808 = vmatpush.msrb.mxu0 %v2677_v18  ;;  %828 = vmatpush.msrb.mxu1 %v2678_v19  ;;  %v2201_v18 = vld [vmem:[#allocation4 + $0x150] sm:$0xff]  ;;  %v2204_v19 = vld [vmem:[#allocation4 + $0x158] sm:$0xff] }
 0x1a0   :  { %848 = vmatpush.msrb.mxu2 %v2679_v20  ;;  %868 = vmatpush.msrb.mxu3 %v2680_v21  ;;  %v2207_v20 = vld [vmem:[#allocation4 + $0x120] sm:$0xff]  ;;  %v2210_v21 = vld [vmem:[#allocation4 + $0x128] sm:$0xff] }
 0x1a1   :  { %809 = vmatpush.msrb.mxu0 %v2681_v23  ;;  %829 = vmatpush.msrb.mxu1 %v2682_v24  ;;  %v2213_v23 = vld [vmem:[#allocation4 + $0x130] sm:$0xff]  ;;  %v2216_v24 = vld [vmem:[#allocation4 + $0x138] sm:$0xff] }
 0x1a2   :  { %849 = vmatpush.msrb.mxu2 %v2683_v25  ;;  %869 = vmatpush.msrb.mxu3 %v2684_v26  ;;  %v2219_v25 = vld [vmem:[#allocation4 + $0x100] sm:$0xff]  ;;  %v2222_v26 = vld [vmem:[#allocation4 + $0x108] sm:$0xff] }
 0x1a3   :  { %810 = vmatpush.msrb.mxu0 %v2685_v27  ;;  %830 = vmatpush.msrb.mxu1 %v2686_v28  ;;  %v2225_v27 = vld [vmem:[#allocation4 + $0x110] sm:$0xff]  ;;  %v2228_v28 = vld [vmem:[#allocation4 + $0x118] sm:$0xff] }
 0x1a4   :  { %850 = vmatpush.msrb.mxu2 %v2687_v29  ;;  %870 = vmatpush.msrb.mxu3 %v2688_v30  ;;  %v2231_v29 = vld [vmem:[#allocation4 + $0xe0] sm:$0xff]  ;;  %v2234_v30 = vld [vmem:[#allocation4 + $0xe8] sm:$0xff] }
 0x200   :  { %v594_v31 = vpop.f32.mrf.mxu0  ;;  %v614_v32 = vpop.f32.mrf.mxu1 }
 0x201   :  { %v657_v34 = vadd.f32 %v594_v31, %v2689_v33  ;;  %v658_v37 = vadd.f32 %v614_v32, %v2690_v36  ;;  %v2237_v31 = vld [vmem:[#allocation4 + $0xf0] sm:$0xff]  ;;  %v2240_v32 = vld [vmem:[#allocation4 + $0xf8] sm:$0xff]  ;;  %v2243_v33 = vld [vmem:[#allocation4 + $0xc0] sm:$0xff] }
 0x202   :  { %v2249_v36 = vld [vmem:[#allocation4 + $0xd0] sm:$0xff] }
 0x203   :  { %v661_v38 = vmul.f32 0.5, %v657_v34  ;;  %v665_v39 = vmul.f32 0.5, %v658_v37  ;;  %v2246_v34 = vld [vmem:[#allocation4 + $0xc8] sm:$0xff]  ;;  %v2252_v37 = vld [vmem:[#allocation4 + $0xd8] sm:$0xff] }
 0x205   :  { %1308 = vtanh.f32 %v661_v38  ;;  %v2255_v38 = vld [vmem:[#allocation4 + $0xa0] sm:$0xff] }
 0x206   :  { %1310 = vtanh.f32 %v665_v39  ;;  %v2258_v39 = vld [vmem:[#allocation4 + $0xa8] sm:$0xff] }
 0x207   :  { %v634_v40 = vpop.f32.mrf.mxu2  ;;  %v654_v41 = vpop.f32.mrf.mxu3 }
 0x208   :  { %v659_v43 = vadd.f32 %v634_v40, %v2691_v42  ;;  %v660_v45 = vadd.f32 %v654_v41, %v2692_v44  ;;  %v2261_v40 = vld [vmem:[#allocation4 + $0xb0] sm:$0xff]  ;;  %v2264_v41 = vld [vmem:[#allocation4 + $0xb8] sm:$0xff]  ;;  %v2267_v42 = vld [vmem:[#allocation4 + $0x80] sm:$0xff] }
 0x209   :  { %2693 = vst [vmem:[#allocation7_spill] sm:$0xff] %v2267_v42  ;;  %v2273_v44 = vld [vmem:[#allocation4 + $0x90] sm:$0xff] }
 0x20a   :  { %1312 = vtanh.f32 %v659_v43  ;;  %v670_v46 = vmul.f32 0.5, %v660_v45  ;;  %v2270_v43 = vld [vmem:[#allocation4 + $0x88] sm:$0xff]  ;;  %2695 = vst [vmem:[#allocation9_spill] sm:$0xff] %v2273_v44  ;;  %v2276_v45 = vld [vmem:[#allocation4 + $0x98] sm:$0xff] }
 0x20b   :  { %v1309_v47 = vpop.eup %1308  ;;  %2694 = vst [vmem:[#allocation8_spill] sm:$0xff] %v2270_v43 }
 0x20c   :  { %v1311_v49 = vpop.eup %1310  ;;  %v663_v50 = vmul.f32 0.5, %v1309_v47  ;;  %1314 = vtanh.f32 %v670_v46  ;;  %2696 = vst [vmem:[#allocation10_spill] sm:$0xff] %v2276_v45  ;;  %v2279_v46 = vld [vmem:[#allocation4 + $0x60] sm:$0xff]  ;;  %v2282_v47 = vld [vmem:[#allocation4 + $0x68] sm:$0xff] }
 0x20d   :  { %v667_v51 = vmul.f32 0.5, %v1311_v49  ;;  %2697 = vst [vmem:[#allocation31_spill] sm:$0xff] %v2279_v46  ;;  %v2285_v49 = vld [vmem:[#allocation4 + $0x70] sm:$0xff] }
 0x20e   :  { %v664_v52 = vadd.f32 0.5, %v663_v50  ;;  %2698 = vst [vmem:[#allocation32_spill] sm:$0xff] %v2282_v47  ;;  %v2288_v50 = vld [vmem:[#allocation4 + $0x78] sm:$0xff] }
 0x20f   :  { %v668_v9 = vadd.f32 0.5, %v667_v51  ;;  %2699 = vst [vmem:[#allocation33_spill] sm:$0xff] %v2285_v49  ;;  %v2291_v51 = vld [vmem:[#allocation4 + $0x40] sm:$0xff] }
 0x210   :  { %v1313_v1 = vpop.eup %1312  ;;  %2700 = vst [vmem:[#allocation34_spill] sm:$0xff] %v2288_v50 }
 0x211   :  { %v674_v57 = vmul.f32 %v668_v9, %v2060_v53  ;;  %v675_v3 = vmul.f32 %v1313_v1, %v664_v52  ;;  %v2162_v53 = vld [vmem:[#allocation4 + $0x1a8] sm:$0xff]  ;;  %2701 = vst [vmem:[#allocation11_spill] sm:$0xff] %v2291_v51  ;;  %v2297_v9 = vld [vmem:[#allocation4 + $0x50] sm:$0xff]  ;;  %v2300_v1 = vld [vmem:[#allocation4 + $0x58] sm:$0xff] }
 0x212   :  { %v1315_v5 = vpop.eup %1314  ;;  %v2294_v52 = vld [vmem:[#allocation4 + $0x48] sm:$0xff]  ;;  %2703 = vst [vmem:[#allocation13_spill] sm:$0xff] %v2297_v9 }
 0x213   :  { %v2132_v7 = vadd.f32 %v675_v3, %v674_v57  ;;  %v672_v22 = vmul.f32 0.5, %v1315_v5  ;;  %2702 = vst [vmem:[#allocation12_spill] sm:$0xff] %v2294_v52  ;;  %v2303_v57 = vld [vmem:[#allocation4 + $0x20] sm:$0xff]  ;;  %v2306_v3 = vld [vmem:[#allocation4 + $0x28] sm:$0xff]  ;;  %v2309_v5 = vld [vmem:[#allocation4 + $0x30] sm:$0xff] }
 0x214   :  { %2704 = vst [vmem:[#allocation14_spill] sm:$0xff] %v2300_v1 }
 0x215   :  { %1316 = vtanh.f32 %v2132_v7  ;;  %v673_v58 = vadd.f32 0.5, %v672_v22  ;;  %2705 = vst [vmem:[#allocation15_spill] sm:$0xff] %v2303_v57  ;;  %v2312_v22 = vld [vmem:[#allocation4 + $0x38] sm:$0xff] }
 0x216   :  { %2706 = vst [vmem:[#allocation16_spill] sm:$0xff] %v2306_v3 }
 0x217   :  { %2707 = vst [vmem:[#allocation17_spill] sm:$0xff] %v2309_v5 }
 0x218   :  { %2708 = vst [vmem:[#allocation18_spill] sm:$0xff] %v2312_v22 }
 0x21b   :  { %v1317_v56 = vpop.eup %1316 }
 0x21c   :  { %v678_v60 = vmul.f32 %v1317_v56, %v673_v58  ;;  %v2315_v58 = vld [vmem:[#allocation4] sm:$0xff]  ;;  %v2318_v56 = vld [vmem:[#allocation4 + $0x8] sm:$0xff] }
 0x21d   :  { %2709 = vst [vmem:[#allocation19_spill] sm:$0xff] %v2315_v58 }
 0x21e   :  { %702 = vmatmul.f32.vlgmr.msra.gmra.mxu0 %v678_v60  ;;  %722 = vmatmul.f32.vlgmr.msra.gmra.mxu1 %v678_v60  ;;  %2710 = vst [vmem:[#allocation20_spill] sm:$0xff] %v2318_v56 }
 0x21f   :  { %742 = vmatmul.f32.vlgmr.msra.gmra.mxu2 %v678_v60  ;;  %762 = vmatmul.f32.vlgmr.msra.gmra.mxu3 %v678_v60  ;;  %v2321_v60 = vld [vmem:[#allocation4 + $0x10] sm:$0xff] }
 0x220   :  { %904 = vmatpush.msra.mxu0 %v2135_v4  ;;  %924 = vmatpush.msra.mxu1 %v2138_v8  ;;  %2711 = vst [vmem:[#allocation21_spill] sm:$0xff] %v2321_v60 }
 0x221   :  { %944 = vmatpush.msra.mxu2 %v2141_v55  ;;  %964 = vmatpush.msra.mxu3 %v2144_v54 }
 0x222   :  { %905 = vmatpush.msra.mxu0 %v2147_v0  ;;  %925 = vmatpush.msra.mxu1 %v2150_v63 }
 0x223   :  { %945 = vmatpush.msra.mxu2 %v2153_v2  ;;  %965 = vmatpush.msra.mxu3 %v2156_v59 }
 0x224   :  { %906 = vmatpush.msra.mxu0 %v2159_v61  ;;  %926 = vmatpush.msra.mxu1 %v2162_v53 }
 0x225   :  { %946 = vmatpush.msra.mxu2 %v2165_v35  ;;  %966 = vmatpush.msra.mxu3 %v2168_v48 }
 0x226   :  { %907 = vmatpush.msra.mxu0 %v2171_v6  ;;  %927 = vmatpush.msra.mxu1 %v2174_v62 }
 0x227   :  { %947 = vmatpush.msra.mxu2 %v2177_v10  ;;  %967 = vmatpush.msra.mxu3 %v2180_v11 }
 0x228   :  { %908 = vmatpush.msra.mxu0 %v2183_v12  ;;  %928 = vmatpush.msra.mxu1 %v2186_v13 }
 0x229   :  { %948 = vmatpush.msra.mxu2 %v2189_v14  ;;  %968 = vmatpush.msra.mxu3 %v2192_v15 }
 0x22a   :  { %909 = vmatpush.msra.mxu0 %v2195_v16  ;;  %929 = vmatpush.msra.mxu1 %v2198_v17 }
 0x22b   :  { %949 = vmatpush.msra.mxu2 %v2201_v18  ;;  %969 = vmatpush.msra.mxu3 %v2204_v19 }
 0x22c   :  { %910 = vmatpush.msra.mxu0 %v2207_v20  ;;  %930 = vmatpush.msra.mxu1 %v2210_v21 }
 0x22d   :  { %950 = vmatpush.msra.mxu2 %v2213_v23  ;;  %970 = vmatpush.msra.mxu3 %v2216_v24 }
 0x22e   :  { %911 = vmatpush.msra.mxu0 %v2219_v25  ;;  %931 = vmatpush.msra.mxu1 %v2222_v26 }
 0x22f   :  { %951 = vmatpush.msra.mxu2 %v2225_v27  ;;  %971 = vmatpush.msra.mxu3 %v2228_v28 }
 0x230   :  { %912 = vmatpush.msra.mxu0 %v2231_v29  ;;  %932 = vmatpush.msra.mxu1 %v2234_v30 }
 0x231   :  { %952 = vmatpush.msra.mxu2 %v2237_v31  ;;  %972 = vmatpush.msra.mxu3 %v2240_v32 }
 0x232   :  { %913 = vmatpush.msra.mxu0 %v2243_v33  ;;  %933 = vmatpush.msra.mxu1 %v2246_v34 }
 0x233   :  { %953 = vmatpush.msra.mxu2 %v2249_v36  ;;  %973 = vmatpush.msra.mxu3 %v2252_v37 }
 0x234   :  { %914 = vmatpush.msra.mxu0 %v2255_v38  ;;  %934 = vmatpush.msra.mxu1 %v2258_v39 }
 0x235   :  { %954 = vmatpush.msra.mxu2 %v2261_v40  ;;  %974 = vmatpush.msra.mxu3 %v2264_v41 }
 0x236   :  { %915 = vmatpush.msra.mxu0 %v2267_v42  ;;  %935 = vmatpush.msra.mxu1 %v2270_v43 }
 0x237   :  { %955 = vmatpush.msra.mxu2 %v2273_v44  ;;  %975 = vmatpush.msra.mxu3 %v2276_v45 }
 0x238   :  { %916 = vmatpush.msra.mxu0 %v2279_v46  ;;  %936 = vmatpush.msra.mxu1 %v2282_v47  ;;  %v2716_v46 = vld [vmem:[#allocation42_spill] sm:$0xff] }
 0x239   :  { %956 = vmatpush.msra.mxu2 %v2285_v49  ;;  %976 = vmatpush.msra.mxu3 %v2288_v50  ;;  %v2715_v49 = vld [vmem:[#allocation41_spill] sm:$0xff] }
 0x23a   :  { %917 = vmatpush.msra.mxu0 %v2291_v51  ;;  %937 = vmatpush.msra.mxu1 %v2294_v52 }
 0x23b   :  { %957 = vmatpush.msra.mxu2 %v2297_v9  ;;  %977 = vmatpush.msra.mxu3 %v2300_v1  ;;  %v2713_v1 = vld [vmem:[#allocation39_spill] sm:$0xff]  ;;  %v2714_v9 = vld [vmem:[#allocation40_spill] sm:$0xff] }
 0x23c   :  { %918 = vmatpush.msra.mxu0 %v2303_v57  ;;  %938 = vmatpush.msra.mxu1 %v2306_v3  ;;  %v2324_v3 = vld [vmem:[#allocation4 + $0x18] sm:$0xff] }
 0x23d   :  { %958 = vmatpush.msra.mxu2 %v2309_v5  ;;  %978 = vmatpush.msra.mxu3 %v2312_v22  ;;  %2712 = vst [vmem:[#allocation22_spill] sm:$0xff] %v2324_v3 }
 0x23e   :  { %919 = vmatpush.msra.mxu0 %v2315_v58  ;;  %939 = vmatpush.msra.mxu1 %v2318_v56 }
 0x23f   :  { %959 = vmatpush.msra.mxu2 %v2321_v60  ;;  %979 = vmatpush.msra.mxu3 %v2324_v3 }
 0x29b   :  { %v703_v5 = vpop.f32.mrf.mxu0  ;;  %v723_v57 = vpop.f32.mrf.mxu1 }
 0x29c   :  { %v766_v22 = vadd.f32 %v703_v5, %v2713_v1  ;;  %v767_v52 = vadd.f32 %v723_v57, %v2714_v9 }
 0x29e   :  { %v770_v51 = vmul.f32 0.5, %v766_v22  ;;  %v774_v58 = vmul.f32 0.5, %v767_v52 }
 0x2a0   :  { %1318 = vtanh.f32 %v770_v51 }
 0x2a1   :  { %1320 = vtanh.f32 %v774_v58  ;;  %v2723_v58 = vld [vmem:[#allocation33_spill] sm:$0xff] }
 0x2a2   :  { %v743_v50 = vpop.f32.mrf.mxu2  ;;  %v763_v56 = vpop.f32.mrf.mxu3 }
 0x2a3   :  { %v768_v47 = vadd.f32 %v743_v50, %v2715_v49  ;;  %v769_v60 = vadd.f32 %v763_v56, %v2716_v46  ;;  %v2724_v56 = vld [vmem:[#allocation34_spill] sm:$0xff] }
 0x2a5   :  { %1322 = vtanh.f32 %v768_v47  ;;  %v779_v45 = vmul.f32 0.5, %v769_v60  ;;  %v2725_v60 = vld [vmem:[#allocation11_spill] sm:$0xff] }
 0x2a6   :  { %v1319_v44 = vpop.eup %1318 }
 0x2a7   :  { %v1321_v3 = vpop.eup %1320  ;;  %v772_v43 = vmul.f32 0.5, %v1319_v44  ;;  %1324 = vtanh.f32 %v779_v45  ;;  %v2720_v44 = vld [vmem:[#allocation10_spill] sm:$0xff]  ;;  %v2721_v45 = vld [vmem:[#allocation31_spill] sm:$0xff] }
 0x2a8   :  { %v776_v42 = vmul.f32 0.5, %v1321_v3  ;;  %v2722_v3 = vld [vmem:[#allocation32_spill] sm:$0xff] }
 0x2a9   :  { %v773_v1 = vadd.f32 0.5, %v772_v43  ;;  %v2719_v43 = vld [vmem:[#allocation9_spill] sm:$0xff] }
 0x2aa   :  { %v777_v5 = vadd.f32 0.5, %v776_v42  ;;  %v2718_v42 = vld [vmem:[#allocation8_spill] sm:$0xff] }
 0x2ab   :  { %v1323_v9 = vpop.eup %1322 }
 0x2ac   :  { %v783_v52 = vmul.f32 %v777_v5, %v2132_v7  ;;  %v784_v51 = vmul.f32 %v1323_v9, %v773_v1  ;;  %v2717_v7 = vld [vmem:[#allocation7_spill] sm:$0xff]  ;;  %v2726_v1 = vld [vmem:[#allocation12_spill] sm:$0xff]  ;;  %v2727_v5 = vld [vmem:[#allocation13_spill] sm:$0xff] }
 0x2ad   :  { %v1325_v57 = vpop.eup %1324  ;;  %v2728_v9 = vld [vmem:[#allocation14_spill] sm:$0xff] }
 0x2ae   :  { %v2332_v22 = vadd.f32 %v784_v51, %v783_v52  ;;  %v781_v49 = vmul.f32 0.5, %v1325_v57  ;;  %v2729_v52 = vld [vmem:[#allocation15_spill] sm:$0xff]  ;;  %v2730_v51 = vld [vmem:[#allocation16_spill] sm:$0xff]  ;;  %v2731_v57 = vld [vmem:[#allocation17_spill] sm:$0xff] }
 0x2b0   :  { %1326 = vtanh.f32 %v2332_v22  ;;  %v782_v46 = vadd.f32 0.5, %v781_v49  ;;  %v2732_v49 = vld [vmem:[#allocation18_spill] sm:$0xff] }
 0x2b6   :  { %v1327_v47 = vpop.eup %1326 }
 0x2b7   :  { %v787_v50 = vmul.f32 %v1327_v47, %v782_v46  ;;  %v2733_v46 = vld [vmem:[#allocation19_spill] sm:$0xff]  ;;  %v2734_v47 = vld [vmem:[#allocation20_spill] sm:$0xff] }
 0x2b9   :  { %811 = vmatmul.f32.vlgmr.msrb.gmra.mxu0 %v787_v50  ;;  %831 = vmatmul.f32.vlgmr.msrb.gmra.mxu1 %v787_v50 }
 0x2ba   :  { %851 = vmatmul.f32.vlgmr.msrb.gmra.mxu2 %v787_v50  ;;  %871 = vmatmul.f32.vlgmr.msrb.gmra.mxu3 %v787_v50  ;;  %v2735_v50 = vld [vmem:[#allocation21_spill] sm:$0xff] }
 0x2bb   :  { %1013 = vmatpush.msrb.mxu0 %v2135_v4  ;;  %1033 = vmatpush.msrb.mxu1 %v2138_v8 }
 0x2bc   :  { %1053 = vmatpush.msrb.mxu2 %v2141_v55  ;;  %1073 = vmatpush.msrb.mxu3 %v2144_v54 }
 0x2bd   :  { %1014 = vmatpush.msrb.mxu0 %v2147_v0  ;;  %1034 = vmatpush.msrb.mxu1 %v2150_v63 }
 0x2be   :  { %1054 = vmatpush.msrb.mxu2 %v2153_v2  ;;  %1074 = vmatpush.msrb.mxu3 %v2156_v59 }
 0x2bf   :  { %1015 = vmatpush.msrb.mxu0 %v2159_v61  ;;  %1035 = vmatpush.msrb.mxu1 %v2162_v53 }
 0x2c0   :  { %1055 = vmatpush.msrb.mxu2 %v2165_v35  ;;  %1075 = vmatpush.msrb.mxu3 %v2168_v48 }
 0x2c1   :  { %1016 = vmatpush.msrb.mxu0 %v2171_v6  ;;  %1036 = vmatpush.msrb.mxu1 %v2174_v62 }
 0x2c2   :  { %1056 = vmatpush.msrb.mxu2 %v2177_v10  ;;  %1076 = vmatpush.msrb.mxu3 %v2180_v11 }
 0x2c3   :  { %1017 = vmatpush.msrb.mxu0 %v2183_v12  ;;  %1037 = vmatpush.msrb.mxu1 %v2186_v13 }
 0x2c4   :  { %1057 = vmatpush.msrb.mxu2 %v2189_v14  ;;  %1077 = vmatpush.msrb.mxu3 %v2192_v15 }
 0x2c5   :  { %1018 = vmatpush.msrb.mxu0 %v2195_v16  ;;  %1038 = vmatpush.msrb.mxu1 %v2198_v17 }
 0x2c6   :  { %1058 = vmatpush.msrb.mxu2 %v2201_v18  ;;  %1078 = vmatpush.msrb.mxu3 %v2204_v19 }
 0x2c7   :  { %1019 = vmatpush.msrb.mxu0 %v2207_v20  ;;  %1039 = vmatpush.msrb.mxu1 %v2210_v21 }
 0x2c8   :  { %1059 = vmatpush.msrb.mxu2 %v2213_v23  ;;  %1079 = vmatpush.msrb.mxu3 %v2216_v24 }
 0x2c9   :  { %1020 = vmatpush.msrb.mxu0 %v2219_v25  ;;  %1040 = vmatpush.msrb.mxu1 %v2222_v26 }
 0x2ca   :  { %1060 = vmatpush.msrb.mxu2 %v2225_v27  ;;  %1080 = vmatpush.msrb.mxu3 %v2228_v28 }
 0x2cb   :  { %1021 = vmatpush.msrb.mxu0 %v2231_v29  ;;  %1041 = vmatpush.msrb.mxu1 %v2234_v30 }
 0x2cc   :  { %1061 = vmatpush.msrb.mxu2 %v2237_v31  ;;  %1081 = vmatpush.msrb.mxu3 %v2240_v32 }
 0x2cd   :  { %1022 = vmatpush.msrb.mxu0 %v2243_v33  ;;  %1042 = vmatpush.msrb.mxu1 %v2246_v34 }
 0x2ce   :  { %1062 = vmatpush.msrb.mxu2 %v2249_v36  ;;  %1082 = vmatpush.msrb.mxu3 %v2252_v37 }
 0x2cf   :  { %1023 = vmatpush.msrb.mxu0 %v2255_v38  ;;  %1043 = vmatpush.msrb.mxu1 %v2258_v39 }
 0x2d0   :  { %1063 = vmatpush.msrb.mxu2 %v2261_v40  ;;  %1083 = vmatpush.msrb.mxu3 %v2264_v41 }
 0x2d1   :  { %1024 = vmatpush.msrb.mxu0 %v2717_v7  ;;  %1044 = vmatpush.msrb.mxu1 %v2718_v42 }
 0x2d2   :  { %1064 = vmatpush.msrb.mxu2 %v2719_v43  ;;  %1084 = vmatpush.msrb.mxu3 %v2720_v44  ;;  %v2740_v44 = vld [vmem:[#allocation46_spill] sm:$0xff] }
 0x2d3   :  { %1025 = vmatpush.msrb.mxu0 %v2721_v45  ;;  %1045 = vmatpush.msrb.mxu1 %v2722_v3  ;;  %v2739_v45 = vld [vmem:[#allocation45_spill] sm:$0xff] }
 0x2d4   :  { %1065 = vmatpush.msrb.mxu2 %v2723_v58  ;;  %1085 = vmatpush.msrb.mxu3 %v2724_v56  ;;  %v2737_v56 = vld [vmem:[#allocation43_spill] sm:$0xff]  ;;  %v2738_v58 = vld [vmem:[#allocation44_spill] sm:$0xff] }
 0x2d5   :  { %1026 = vmatpush.msrb.mxu0 %v2725_v60  ;;  %1046 = vmatpush.msrb.mxu1 %v2726_v1  ;;  %v2736_v60 = vld [vmem:[#allocation22_spill] sm:$0xff] }
 0x2d6   :  { %1066 = vmatpush.msrb.mxu2 %v2727_v5  ;;  %1086 = vmatpush.msrb.mxu3 %v2728_v9 }
 0x2d7   :  { %1027 = vmatpush.msrb.mxu0 %v2729_v52  ;;  %1047 = vmatpush.msrb.mxu1 %v2730_v51 }
 0x2d8   :  { %1067 = vmatpush.msrb.mxu2 %v2731_v57  ;;  %1087 = vmatpush.msrb.mxu3 %v2732_v49 }
 0x2d9   :  { %1028 = vmatpush.msrb.mxu0 %v2733_v46  ;;  %1048 = vmatpush.msrb.mxu1 %v2734_v47 }
 0x2da   :  { %1068 = vmatpush.msrb.mxu2 %v2735_v50  ;;  %1088 = vmatpush.msrb.mxu3 %v2736_v60 }
 0x336   :  { %v812_v1 = vpop.f32.mrf.mxu0  ;;  %v832_v5 = vpop.f32.mrf.mxu1 }
 0x337   :  { %v875_v9 = vadd.f32 %v812_v1, %v2737_v56  ;;  %v876_v52 = vadd.f32 %v832_v5, %v2738_v58 }
 0x339   :  { %v879_v3 = vmul.f32 0.5, %v875_v9  ;;  %v883_v51 = vmul.f32 0.5, %v876_v52 }
 0x33b   :  { %1328 = vtanh.f32 %v879_v3 }
 0x33c   :  { %1330 = vtanh.f32 %v883_v51 }
 0x33d   :  { %v852_v57 = vpop.f32.mrf.mxu2  ;;  %v872_v49 = vpop.f32.mrf.mxu3 }
 0x33e   :  { %v877_v46 = vadd.f32 %v852_v57, %v2739_v45  ;;  %v878_v47 = vadd.f32 %v872_v49, %v2740_v44 }
 0x340   :  { %1332 = vtanh.f32 %v877_v46  ;;  %v888_v50 = vmul.f32 0.5, %v878_v47 }
 0x341   :  { %v1329_v43 = vpop.eup %1328 }
 0x342   :  { %v1331_v60 = vpop.eup %1330  ;;  %v881_v42 = vmul.f32 0.5, %v1329_v43  ;;  %1334 = vtanh.f32 %v888_v50  ;;  %v2765_v50 = vld [vmem:[#allocation51_spill] sm:$0xff] }
 0x343   :  { %v885_v7 = vmul.f32 0.5, %v1331_v60 }
 0x344   :  { %v882_v56 = vadd.f32 0.5, %v881_v42 }
 0x345   :  { %v886_v1 = vadd.f32 0.5, %v885_v7 }
 0x346   :  { %v1333_v58 = vpop.eup %1332 }
 0x347   :  { %v892_v5 = vmul.f32 %v886_v1, %v2332_v22  ;;  %v893_v3 = vmul.f32 %v1333_v58, %v882_v56  ;;  %v2766_v1 = vld [vmem:[#allocation52_spill] sm:$0xff] }
 0x348   :  { %v1335_v9 = vpop.eup %1334 }
 0x349   :  { %v2404_v52 = vadd.f32 %v893_v3, %v892_v5  ;;  %v890_v45 = vmul.f32 0.5, %v1335_v9 }
 0x34b   :  { %1336 = vtanh.f32 %v2404_v52  ;;  %v891_v44 = vadd.f32 0.5, %v890_v45  ;;  %v2767_v45 = vld [vmem:[#allocation53_spill] sm:$0xff] }
 0x351   :  { %v1337_v51 = vpop.eup %1336 }
 0x352   :  { %v896_v57 = vmul.f32 %v1337_v51, %v891_v44  ;;  %v2768_v51 = vld [vmem:[#allocation54_spill] sm:$0xff] }
 0x354   :  { %920 = vmatmul.f32.vlgmr.msra.gmra.mxu0 %v896_v57  ;;  %940 = vmatmul.f32.vlgmr.msra.gmra.mxu1 %v896_v57 }
 0x355   :  { %960 = vmatmul.f32.vlgmr.msra.gmra.mxu2 %v896_v57  ;;  %980 = vmatmul.f32.vlgmr.msra.gmra.mxu3 %v896_v57 }
 0x356   :  { %1122 = vmatpush.msra.mxu0 %v2135_v4  ;;  %1142 = vmatpush.msra.mxu1 %v2138_v8  ;;  %v2741_v4 = vld [vmem:[#allocation7_spill] sm:$0xff]  ;;  %v2742_v8 = vld [vmem:[#allocation8_spill] sm:$0xff] }
 0x357   :  { %1162 = vmatpush.msra.mxu2 %v2141_v55  ;;  %1182 = vmatpush.msra.mxu3 %v2144_v54  ;;  %v2743_v55 = vld [vmem:[#allocation9_spill] sm:$0xff]  ;;  %v2744_v54 = vld [vmem:[#allocation10_spill] sm:$0xff] }
 0x358   :  { %1123 = vmatpush.msra.mxu0 %v2147_v0  ;;  %1143 = vmatpush.msra.mxu1 %v2150_v63  ;;  %v2745_v0 = vld [vmem:[#allocation31_spill] sm:$0xff]  ;;  %v2746_v63 = vld [vmem:[#allocation32_spill] sm:$0xff] }
 0x359   :  { %1163 = vmatpush.msra.mxu2 %v2153_v2  ;;  %1183 = vmatpush.msra.mxu3 %v2156_v59  ;;  %v2747_v2 = vld [vmem:[#allocation33_spill] sm:$0xff]  ;;  %v2748_v59 = vld [vmem:[#allocation34_spill] sm:$0xff] }
 0x35a   :  { %1124 = vmatpush.msra.mxu0 %v2159_v61  ;;  %1144 = vmatpush.msra.mxu1 %v2162_v53  ;;  %v2749_v61 = vld [vmem:[#allocation11_spill] sm:$0xff]  ;;  %v2750_v53 = vld [vmem:[#allocation12_spill] sm:$0xff] }
 0x35b   :  { %1164 = vmatpush.msra.mxu2 %v2165_v35  ;;  %1184 = vmatpush.msra.mxu3 %v2168_v48  ;;  %v2751_v35 = vld [vmem:[#allocation13_spill] sm:$0xff]  ;;  %v2752_v48 = vld [vmem:[#allocation14_spill] sm:$0xff] }
 0x35c   :  { %1125 = vmatpush.msra.mxu0 %v2171_v6  ;;  %1145 = vmatpush.msra.mxu1 %v2174_v62  ;;  %v2753_v6 = vld [vmem:[#allocation15_spill] sm:$0xff]  ;;  %v2754_v62 = vld [vmem:[#allocation16_spill] sm:$0xff] }
 0x35d   :  { %1165 = vmatpush.msra.mxu2 %v2177_v10  ;;  %1185 = vmatpush.msra.mxu3 %v2180_v11  ;;  %v2755_v10 = vld [vmem:[#allocation17_spill] sm:$0xff]  ;;  %v2756_v11 = vld [vmem:[#allocation18_spill] sm:$0xff] }
 0x35e   :  { %1126 = vmatpush.msra.mxu0 %v2183_v12  ;;  %1146 = vmatpush.msra.mxu1 %v2186_v13  ;;  %v2757_v12 = vld [vmem:[#allocation19_spill] sm:$0xff]  ;;  %v2758_v13 = vld [vmem:[#allocation20_spill] sm:$0xff] }
 0x35f   :  { %1166 = vmatpush.msra.mxu2 %v2189_v14  ;;  %1186 = vmatpush.msra.mxu3 %v2192_v15  ;;  %v2759_v14 = vld [vmem:[#allocation21_spill] sm:$0xff]  ;;  %v2760_v15 = vld [vmem:[#allocation22_spill] sm:$0xff] }
 0x360   :  { %1127 = vmatpush.msra.mxu0 %v2195_v16  ;;  %1147 = vmatpush.msra.mxu1 %v2198_v17 }
 0x361   :  { %1167 = vmatpush.msra.mxu2 %v2201_v18  ;;  %1187 = vmatpush.msra.mxu3 %v2204_v19  ;;  %v2761_v18 = vld [vmem:[#allocation47_spill] sm:$0xff] }
 0x362   :  { %1128 = vmatpush.msra.mxu0 %v2207_v20  ;;  %1148 = vmatpush.msra.mxu1 %v2210_v21  ;;  %v2762_v20 = vld [vmem:[#allocation48_spill] sm:$0xff] }
 0x363   :  { %1168 = vmatpush.msra.mxu2 %v2213_v23  ;;  %1188 = vmatpush.msra.mxu3 %v2216_v24 }
 0x364   :  { %1129 = vmatpush.msra.mxu0 %v2219_v25  ;;  %1149 = vmatpush.msra.mxu1 %v2222_v26 }
 0x365   :  { %1169 = vmatpush.msra.mxu2 %v2225_v27  ;;  %1189 = vmatpush.msra.mxu3 %v2228_v28  ;;  %v2763_v27 = vld [vmem:[#allocation49_spill] sm:$0xff] }
 0x366   :  { %1130 = vmatpush.msra.mxu0 %v2231_v29  ;;  %1150 = vmatpush.msra.mxu1 %v2234_v30  ;;  %v2764_v29 = vld [vmem:[#allocation50_spill] sm:$0xff] }
 0x367   :  { %1170 = vmatpush.msra.mxu2 %v2237_v31  ;;  %1190 = vmatpush.msra.mxu3 %v2240_v32 }
 0x368   :  { %1131 = vmatpush.msra.mxu0 %v2243_v33  ;;  %1151 = vmatpush.msra.mxu1 %v2246_v34 }
 0x369   :  { %1171 = vmatpush.msra.mxu2 %v2249_v36  ;;  %1191 = vmatpush.msra.mxu3 %v2252_v37 }
 0x36a   :  { %1132 = vmatpush.msra.mxu0 %v2255_v38  ;;  %1152 = vmatpush.msra.mxu1 %v2258_v39 }
 0x36b   :  { %1172 = vmatpush.msra.mxu2 %v2261_v40  ;;  %1192 = vmatpush.msra.mxu3 %v2264_v41 }
 0x36c   :  { %1133 = vmatpush.msra.mxu0 %v2741_v4  ;;  %1153 = vmatpush.msra.mxu1 %v2742_v8 }
 0x36d   :  { %1173 = vmatpush.msra.mxu2 %v2743_v55  ;;  %1193 = vmatpush.msra.mxu3 %v2744_v54 }
 0x36e   :  { %1134 = vmatpush.msra.mxu0 %v2745_v0  ;;  %1154 = vmatpush.msra.mxu1 %v2746_v63 }
 0x36f   :  { %1174 = vmatpush.msra.mxu2 %v2747_v2  ;;  %1194 = vmatpush.msra.mxu3 %v2748_v59 }
 0x370   :  { %1135 = vmatpush.msra.mxu0 %v2749_v61  ;;  %1155 = vmatpush.msra.mxu1 %v2750_v53 }
 0x371   :  { %1175 = vmatpush.msra.mxu2 %v2751_v35  ;;  %1195 = vmatpush.msra.mxu3 %v2752_v48 }
 0x372   :  { %1136 = vmatpush.msra.mxu0 %v2753_v6  ;;  %1156 = vmatpush.msra.mxu1 %v2754_v62 }
 0x373   :  { %1176 = vmatpush.msra.mxu2 %v2755_v10  ;;  %1196 = vmatpush.msra.mxu3 %v2756_v11 }
 0x374   :  { %1137 = vmatpush.msra.mxu0 %v2757_v12  ;;  %1157 = vmatpush.msra.mxu1 %v2758_v13 }
 0x375   :  { %1177 = vmatpush.msra.mxu2 %v2759_v14  ;;  %1197 = vmatpush.msra.mxu3 %v2760_v15  ;;  %v2769_v14 = vld [vmem:[#allocation55_spill] sm:$0xff] }
 0x3d1   :  { %v921_v16 = vpop.f32.mrf.mxu0  ;;  %v941_v17 = vpop.f32.mrf.mxu1 }
 0x3d2   :  { %v984_v19 = vadd.f32 %v921_v16, %v2761_v18  ;;  %v985_v21 = vadd.f32 %v941_v17, %v2762_v20  ;;  %v2770_v16 = vld [vmem:[#allocation56_spill] sm:$0xff] }
 0x3d4   :  { %v988_v23 = vmul.f32 0.5, %v984_v19  ;;  %v992_v24 = vmul.f32 0.5, %v985_v21 }
 0x3d6   :  { %1338 = vtanh.f32 %v988_v23  ;;  %v2771_v23 = vld [vmem:[#allocation57_spill] sm:$0xff] }
 0x3d7   :  { %1340 = vtanh.f32 %v992_v24 }
 0x3d8   :  { %v961_v25 = vpop.f32.mrf.mxu2  ;;  %v981_v26 = vpop.f32.mrf.mxu3 }
 0x3d9   :  { %v986_v28 = vadd.f32 %v961_v25, %v2763_v27  ;;  %v987_v30 = vadd.f32 %v981_v26, %v2764_v29  ;;  %v2772_v25 = vld [vmem:[#allocation58_spill] sm:$0xff] }
 0x3db   :  { %1342 = vtanh.f32 %v986_v28  ;;  %v997_v31 = vmul.f32 0.5, %v987_v30 }
 0x3dc   :  { %v1339_v32 = vpop.eup %1338 }
 0x3dd   :  { %v1341_v33 = vpop.eup %1340  ;;  %v990_v34 = vmul.f32 0.5, %v1339_v32  ;;  %1344 = vtanh.f32 %v997_v31 }
 0x3de   :  { %v994_v36 = vmul.f32 0.5, %v1341_v33 }
 0x3df   :  { %v991_v37 = vadd.f32 0.5, %v990_v34 }
 0x3e0   :  { %v995_v38 = vadd.f32 0.5, %v994_v36 }
 0x3e1   :  { %v1343_v39 = vpop.eup %1342 }
 0x3e2   :  { %v1001_v40 = vmul.f32 %v995_v38, %v2404_v52  ;;  %v1002_v41 = vmul.f32 %v1343_v39, %v991_v37 }
 0x3e3   :  { %v1345_v22 = vpop.eup %1344 }
 0x3e4   :  { %v1003_v7 = vadd.f32 %v1002_v41, %v1001_v40  ;;  %v999_v42 = vmul.f32 0.5, %v1345_v22  ;;  %v1286_v22 = vld [vmem:[%s2494_s4] ss:$0 sm:$0xff] }
 0x3e6   :  { %1346 = vtanh.f32 %v1003_v7  ;;  %v1000_v43 = vadd.f32 0.5, %v999_v42 }
 0x3ec   :  { %v1347_v60 = vpop.eup %1346 }
 0x3ed   :  { %v1005_v49 = vmul.f32 %v1347_v60, %v1000_v43  ;;  %v1287_v60 = vld [vmem:[#allocation3] ss:$0 sm:$0xff] }
 0x3ef   :  { %1029 = vmatmul.f32.vlgmr.msrb.gmra.mxu0 %v1005_v49  ;;  %1049 = vmatmul.f32.vlgmr.msrb.gmra.mxu1 %v1005_v49 }
 0x3f0   :  { %1069 = vmatmul.f32.vlgmr.msrb.gmra.mxu2 %v1005_v49  ;;  %1089 = vmatmul.f32.vlgmr.msrb.gmra.mxu3 %v1005_v49 }
 0x46c   :  { %v1030_v46 = vpop.f32.mrf.mxu0  ;;  %v1050_v47 = vpop.f32.mrf.mxu1 }
 0x46d   :  { %v1093_v56 = vadd.f32 %v1030_v46, %v2765_v50  ;;  %v1094_v58 = vadd.f32 %v1050_v47, %v2766_v1 }
 0x46f   :  { %v1097_v5 = vmul.f32 0.5, %v1093_v56  ;;  %v1101_v3 = vmul.f32 0.5, %v1094_v58 }
 0x471   :  { %1348 = vtanh.f32 %v1097_v5 }
 0x472   :  { %1350 = vtanh.f32 %v1101_v3 }
 0x473   :  { %v1070_v9 = vpop.f32.mrf.mxu2  ;;  %v1090_v52 = vpop.f32.mrf.mxu3 }
 0x474   :  { %v1095_v44 = vadd.f32 %v1070_v9, %v2767_v45  ;;  %v1096_v57 = vadd.f32 %v1090_v52, %v2768_v51 }
 0x476   :  { %1352 = vtanh.f32 %v1095_v44  ;;  %v1106_v4 = vmul.f32 0.5, %v1096_v57 }
 0x477   :  { %v1349_v8 = vpop.eup %1348 }
 0x478   :  { %v1351_v55 = vpop.eup %1350  ;;  %v1099_v54 = vmul.f32 0.5, %v1349_v8  ;;  %1354 = vtanh.f32 %v1106_v4 }
 0x479   :  { %v1103_v0 = vmul.f32 0.5, %v1351_v55 }
 0x47a   :  { %v1100_v63 = vadd.f32 0.5, %v1099_v54 }
 0x47b   :  { %v1104_v2 = vadd.f32 0.5, %v1103_v0 }
 0x47c   :  { %v1353_v59 = vpop.eup %1352 }
 0x47d   :  { %v1110_v61 = vmul.f32 %v1104_v2, %v1003_v7  ;;  %v1111_v53 = vmul.f32 %v1353_v59, %v1100_v63 }
 0x47e   :  { %v1355_v35 = vpop.eup %1354 }
 0x47f   :  { %v1112_v48 = vadd.f32 %v1111_v53, %v1110_v61  ;;  %v1108_v6 = vmul.f32 0.5, %v1355_v35 }
 0x481   :  { %1356 = vtanh.f32 %v1112_v48  ;;  %v1109_v62 = vadd.f32 0.5, %v1108_v6 }
 0x487   :  { %v1357_v10 = vpop.eup %1356 }
 0x488   :  { %v1114_v11 = vmul.f32 %v1357_v10, %v1109_v62 }
 0x48a   :  { %1138 = vmatmul.f32.vlgmr.msra.gmra.mxu0 %v1114_v11  ;;  %1158 = vmatmul.f32.vlgmr.msra.gmra.mxu1 %v1114_v11 }
 0x48b   :  { %1178 = vmatmul.f32.vlgmr.msra.gmra.mxu2 %v1114_v11  ;;  %1198 = vmatmul.f32.vlgmr.msra.gmra.mxu3 %v1114_v11 }
 0x507   :  { %v1139_v12 = vpop.f32.mrf.mxu0  ;;  %v1159_v13 = vpop.f32.mrf.mxu1 }
 0x508   :  { %v1202_v15 = vadd.f32 %v1139_v12, %v2769_v14  ;;  %v1203_v17 = vadd.f32 %v1159_v13, %v2770_v16 }
 0x50a   :  { %v1206_v18 = vmul.f32 0.5, %v1202_v15  ;;  %v1210_v19 = vmul.f32 0.5, %v1203_v17 }
 0x50c   :  { %1358 = vtanh.f32 %v1206_v18 }
 0x50d   :  { %1360 = vtanh.f32 %v1210_v19 }
 0x50e   :  { %v1179_v20 = vpop.f32.mrf.mxu2  ;;  %v1199_v21 = vpop.f32.mrf.mxu3 }
 0x50f   :  { %v1204_v24 = vadd.f32 %v1179_v20, %v2771_v23  ;;  %v1205_v26 = vadd.f32 %v1199_v21, %v2772_v25 }
 0x511   :  { %1362 = vtanh.f32 %v1204_v24  ;;  %v1215_v27 = vmul.f32 0.5, %v1205_v26 }
 0x512   :  { %v1359_v28 = vpop.eup %1358 }
 0x513   :  { %v1361_v29 = vpop.eup %1360  ;;  %v1208_v30 = vmul.f32 0.5, %v1359_v28  ;;  %1364 = vtanh.f32 %v1215_v27 }
 0x514   :  { %v1212_v31 = vmul.f32 0.5, %v1361_v29 }
 0x515   :  { %v1209_v32 = vadd.f32 0.5, %v1208_v30 }
 0x516   :  { %v1213_v33 = vadd.f32 0.5, %v1212_v31 }
 0x517   :  { %v1363_v34 = vpop.eup %1362 }
 0x518   :  { %v1219_v36 = vmul.f32 %v1213_v33, %v1112_v48  ;;  %v1220_v37 = vmul.f32 %v1363_v34, %v1209_v32 }
 0x519   :  { %v1365_v38 = vpop.eup %1364 }
 0x51a   :  { %v1221_v39 = vadd.f32 %v1220_v37, %v1219_v36  ;;  %v1217_v40 = vmul.f32 0.5, %v1365_v38 }
 0x51c   :  { %1366 = vtanh.f32 %v1221_v39  ;;  %v1218_v41 = vadd.f32 0.5, %v1217_v40 }
 0x522   :  { %v1367_v7 = vpop.eup %1366 }
 0x523   :  { %v1223_v42 = vmul.f32 %v1367_v7, %v1218_v41 }
 0x525   :  { %v1228_v43 = vmul.f32 %v1286_v22, %v1223_v42 }
 0x527   :  { %1229 = vadd.xlane.f32.xlu0 %v1228_v43 }
 0x59a   :  { %v1230_v49 = vpop.xlane.xlu0 %1229 }
 0x59b   :  { %v1235_v46 = vadd.f32 %v1287_v60, %v1230_v49 }
 0x59d   :  { %1237 = vst.msk [vmem:[%s2496_s6] sm:$0xff] %vm1236_vm1, %v1235_v46 }
 0x59e   :  { %1242 = vsyncpa [#allocation5], 1 }

</bundles_post_ra>
